<compile_context>
chip_gen: v7x
topology: tpu7x:2x2x1
jax: 0.10.0
libtpu: 0.0.40
codegen_flags: <defaults>
</compile_context>

<pallas_src>
import functools

import jax
import jax.numpy as jnp
from jax.experimental import pallas as pl
from jax.experimental.pallas import tpu as pltpu


# ----------------------------- Pallas kernels ------------------------------ #

def _layernorm(x, g, b, eps=1e-5):
    mu = jnp.mean(x, axis=-1, keepdims=True)
    var = jnp.mean((x - mu) ** 2, axis=-1, keepdims=True)
    return (x - mu) * jax.lax.rsqrt(var + eps) * g + b


def _branch_kernel(*refs, depth, heads, dim_head, n_valid):
    """Fully fused ViT branch for one batch element.

    refs layout (inputs, then output):
      tokens (1, Np, P) bf16, embed_w (P, dim) bf16, embed_b (1, dim),
      cls (1, dim), pos (Np, dim),
      depth x [ln1_g, ln1_b, w_qkv, w_o, b_o, ln2_g, ln2_b, w1, b1, w2, b2],
      lnf_g, lnf_b, out (1, 1, dim)
    """
    idx = 0
    tok_ref = refs[idx]; idx += 1
    emb_w = refs[idx]; idx += 1
    emb_b = refs[idx]; idx += 1
    cls_ref = refs[idx]; idx += 1
    pos_ref = refs[idx]; idx += 1
    layers = []
    for _ in range(depth):
        layers.append(refs[idx:idx + 11]); idx += 11
    lnf_g = refs[idx]; idx += 1
    lnf_b = refs[idx]; idx += 1
    out_ref = refs[idx]

    Np = tok_ref.shape[1]
    inner = heads * dim_head
    scale = dim_head ** -0.5

    # ---- patch embedding + cls token + positional embedding (f32) ----
    x = jnp.dot(tok_ref[0], emb_w[...], preferred_element_type=jnp.float32)
    x = x + emb_b[...]
    row = jax.lax.broadcasted_iota(jnp.int32, (Np, 1), 0)
    x = jnp.where(row == 0, cls_ref[...], x)            # row 0 := learned cls token
    x = x + pos_ref[...]

    # additive key mask for the padded token rows (keys >= n_valid ignored)
    col = jax.lax.broadcasted_iota(jnp.int32, (1, Np), 1)
    key_bias = jnp.where(col < n_valid, 0.0, -1e30).astype(jnp.float32)

    for (ln1_g, ln1_b, w_qkv, w_o, b_o,
         ln2_g, ln2_b, w1, b1, w2, b2) in layers:
        # ---------------- multi-head self-attention ----------------
        h = _layernorm(x, ln1_g[...], ln1_b[...])
        qkv = jnp.dot(h.astype(jnp.bfloat16), w_qkv[...],
                      preferred_element_type=jnp.float32)        # (Np, 3*inner), no bias
        head_out = []
        for hh in range(heads):                                   # static unroll
            q = qkv[:, hh * dim_head:(hh + 1) * dim_head] * scale
            k = qkv[:, inner + hh * dim_head: inner + (hh + 1) * dim_head]
            v = qkv[:, 2 * inner + hh * dim_head: 2 * inner + (hh + 1) * dim_head]
            s = jax.lax.dot_general(                              # q @ k^T, no transpose op
                q.astype(jnp.bfloat16), k.astype(jnp.bfloat16),
                (((1,), (1,)), ((), ())),
                preferred_element_type=jnp.float32)               # (Np, Np)
            s = s + key_bias
            s = s - jnp.max(s, axis=-1, keepdims=True)
            p = jnp.exp(s)
            l = jnp.sum(p, axis=-1, keepdims=True)
            p = p * pl.reciprocal(l, approx=True)                 # EUP divide (free slot)
            head_out.append(jnp.dot(p.astype(jnp.bfloat16),
                                    v.astype(jnp.bfloat16),
                                    preferred_element_type=jnp.float32))
        a = jnp.concatenate(head_out, axis=-1)                    # (Np, inner) lane-dense
        a = jnp.dot(a.astype(jnp.bfloat16), w_o[...],
                    preferred_element_type=jnp.float32) + b_o[...]
        x = x + a
        # --------------------------- MLP ---------------------------
        h = _layernorm(x, ln2_g[...], ln2_b[...])
        h = jnp.dot(h.astype(jnp.bfloat16), w1[...],
                    preferred_element_type=jnp.float32) + b1[...]
        # TODO(synk): tanh-approx GELU vs PyTorch erf default.
        h = jax.nn.gelu(h)
        h = jnp.dot(h.astype(jnp.bfloat16), w2[...],
                    preferred_element_type=jnp.float32) + b2[...]
        x = x + h

    x = _layernorm(x, lnf_g[...], lnf_b[...])
    out_ref[0] = x[0:1, :].astype(out_ref.dtype)                  # cls pooling


def run_branch(tokens, p, heads, dim_head):
    """tokens: (B, N, patch_dim) f32 -> pooled cls feature (B, dim). One pallas_call."""
    B, N, P = tokens.shape
    dim = p["embed_w"].shape[1]
    depth = len(p["layers"])
    n_valid = N + 1
    Np = ((n_valid + 7) // 8) * 8                                 # 8-aligned sublanes

    # token slab: row 0 reserved for cls, rows 1..N real, rest zero padding
    tok_pad = jnp.zeros((B, Np, P), jnp.bfloat16)
    tok_pad = tok_pad.at[:, 1:n_valid].set(tokens.astype(jnp.bfloat16))
    pos_pad = jnp.zeros((Np, dim), jnp.float32)
    pos_pad = pos_pad.at[:n_valid].set(p["pos"][0, :n_valid])

    inputs = [tok_pad,
              p["embed_w"].astype(jnp.bfloat16),
              p["embed_b"].reshape(1, dim),
              p["cls"].reshape(1, dim),
              pos_pad]
    for lyr in p["layers"]:
        inputs += [lyr["ln1_g"].reshape(1, dim), lyr["ln1_b"].reshape(1, dim),
                   lyr["w_qkv"].astype(jnp.bfloat16),
                   lyr["w_o"].astype(jnp.bfloat16), lyr["b_o"].reshape(1, dim),
                   lyr["ln2_g"].reshape(1, dim), lyr["ln2_b"].reshape(1, dim),
                   lyr["w1"].astype(jnp.bfloat16), lyr["b1"].reshape(1, -1),
                   lyr["w2"].astype(jnp.bfloat16), lyr["b2"].reshape(1, dim)]
    inputs += [p["lnf_g"].reshape(1, dim), p["lnf_b"].reshape(1, dim)]

    in_specs = [pl.BlockSpec((1, Np, P), lambda b: (b, 0, 0))]
    for a in inputs[1:]:
        in_specs.append(pl.BlockSpec(a.shape, lambda b, nd=a.ndim: (0,) * nd))

    out = pl.pallas_call(
        functools.partial(_branch_kernel, depth=depth, heads=heads,
                          dim_head=dim_head, n_valid=n_valid),
        out_shape=jax.ShapeDtypeStruct((B, 1, dim), jnp.float32),
        grid=(B,),
        in_specs=in_specs,
        out_specs=pl.BlockSpec((1, 1, dim), lambda b: (b, 0, 0)),
        compiler_params=pltpu.CompilerParams(dimension_semantics=("parallel",)),
    )(*inputs)
    return out[:, 0]                                              # (B, dim)


def _se_kernel(x_ref, w_ref, o_ref):
    x = x_ref[...]
    gate = jnp.dot(x.astype(jnp.bfloat16), w_ref[...],
                   preferred_element_type=jnp.float32)
    o_ref[...] = (x * gate).astype(o_ref.dtype)


def se_multiply(x, w):
    """Fused: out = x * (x @ W)  (bias-free squeeze-excite gate)."""
    B, D = x.shape
    return pl.pallas_call(
        _se_kernel,
        out_shape=jax.ShapeDtypeStruct((B, D), x.dtype),
        grid=(1,),
        in_specs=[pl.BlockSpec((B, D), lambda i: (0, 0)),
                  pl.BlockSpec((D, D), lambda i: (0, 0))],
        out_specs=pl.BlockSpec((B, D), lambda i: (0, 0)),
        compiler_params=pltpu.CompilerParams(dimension_semantics=("arbitrary",)),
    )(x, w.astype(jnp.bfloat16))


# ------------------------- parameter initialization ------------------------ #

def _normal(key, shape, std=0.02):
    return std * jax.random.normal(key, shape, jnp.float32)


def init_branch(key, num_tokens, patch_dim, dim, depth, heads, dim_head, mlp_dim):
    keys = jax.random.split(key, 3 + depth)
    inner = heads * dim_head
    p = {
        "embed_w": _normal(keys[0], (patch_dim, dim)),
        "embed_b": jnp.zeros((dim,), jnp.float32),
        "pos": _normal(keys[1], (1, num_tokens + 1, dim)),
        "cls": _normal(keys[2], (1, 1, dim)),
        "lnf_g": jnp.ones((dim,), jnp.float32),
        "lnf_b": jnp.zeros((dim,), jnp.float32),
        "layers": [],
    }
    for d in range(depth):
        lk = jax.random.split(keys[3 + d], 4)
        p["layers"].append(dict(
            ln1_g=jnp.ones((dim,), jnp.float32), ln1_b=jnp.zeros((dim,), jnp.float32),
            w_qkv=_normal(lk[0], (dim, 3 * inner)),
            w_o=_normal(lk[1], (inner, dim)), b_o=jnp.zeros((dim,), jnp.float32),
            ln2_g=jnp.ones((dim,), jnp.float32), ln2_b=jnp.zeros((dim,), jnp.float32),
            w1=_normal(lk[2], (dim, mlp_dim)), b1=jnp.zeros((mlp_dim,), jnp.float32),
            w2=_normal(lk[3], (mlp_dim, dim)), b2=jnp.zeros((dim,), jnp.float32),
        ))
    return p


def init_generator(key, *, input_channels, patch_size, spe_dim, spa_dim,
                   spe_patch_size, depth, stride, dim_head, heads):
    k_spa, k_spe, k_se = jax.random.split(key, 3)
    n_spa_tok = patch_size * patch_size                           # patch_size=1 per pixel
    n_spe_tok = (input_channels - spe_patch_size) // stride + 1   # band groups
    return {
        "spatial": init_branch(k_spa, n_spa_tok, input_channels,
                               spa_dim, depth, heads, dim_head, spa_dim * 4),
        "spectral": init_branch(k_spe, n_spe_tok,
                                spe_patch_size * patch_size * patch_size,
                                spe_dim, depth, heads, dim_head, spe_dim * 4),
        "se_w": _normal(k_se, (spe_dim + spa_dim, spe_dim + spa_dim)),
        "cfg": dict(heads=heads, dim_head=dim_head, stride=stride,
                    spe_patch_size=spe_patch_size, n_spe_tok=n_spe_tok),
    }


# ------------------------------ forward pass ------------------------------- #

def generator_forward(params, x):
    """x: (B, C, H, W) float32 (NCHW). Returns (B, spe_dim + spa_dim)."""
    B, C, H, W = x.shape
    cfg = params["cfg"]
    heads, dim_head = cfg["heads"], cfg["dim_head"]
    stride, sp, n_tok = cfg["stride"], cfg["spe_patch_size"], cfg["n_spe_tok"]

    # spectral branch: band-group tokens (each token = spe_patch_size bands x H x W)
    spe_tokens = jnp.stack(
        [x[:, i * stride: i * stride + sp].reshape(B, -1) for i in range(n_tok)],
        axis=1)                                                   # (B, n_tok, sp*H*W)
    x_spectral = run_branch(spe_tokens, params["spectral"], heads, dim_head)

    # spatial branch: pixel tokens (patch_size=1), each token = C bands of one pixel
    spa_tokens = jnp.transpose(x, (0, 2, 3, 1)).reshape(B, H * W, C)
    x_spatial = run_branch(spa_tokens, params["spatial"], heads, dim_head)

    # concat (spectral first, matching torch.cat([x_spectral, x_spatial], dim=1))
    feat = jnp.concatenate([x_spectral, x_spatial], axis=1)
    return se_multiply(feat, params["se_w"])


# ----------------------------------- main ----------------------------------- #

if __name__ == "__main__":
    key = jax.random.PRNGKey(0)
    k_x, k_p = jax.random.split(key)

    # module hyperparameters (small)
    input_channels = 16
    patch_size = 8          # spatial cube size
    spe_dim = 32
    spa_dim = 32
    spe_patch_size = 4
    depth = 1
    stride = 4
    dim_head = 16
    heads = 4

    B = 2
    x = jax.random.normal(k_x, (B, input_channels, patch_size, patch_size), jnp.float32)

    params = init_generator(
        k_p,
        input_channels=input_channels, patch_size=patch_size,
        spe_dim=spe_dim, spa_dim=spa_dim,
        spe_patch_size=spe_patch_size, depth=depth, stride=stride,
        dim_head=dim_head, heads=heads,
    )

    out = generator_forward(params, x)
    out = jax.block_until_ready(out)
    assert out.shape == (B, spe_dim + spa_dim), out.shape
    print("KERNEL_OK")
</pallas_src>

<mosaic_0001>
module attributes {stable_mosaic.version = 11 : i64} {
  func.func @_branch_kernel(%arg0: i32, %arg1: memref<1x8x256xbf16, #tpu.memory_space<vmem>>, %arg2: memref<256x32xbf16, #tpu.memory_space<vmem>>, %arg3: memref<1x32xf32, #tpu.memory_space<vmem>>, %arg4: memref<1x32xf32, #tpu.memory_space<vmem>>, %arg5: memref<8x32xf32, #tpu.memory_space<vmem>>, %arg6: memref<1x32xf32, #tpu.memory_space<vmem>>, %arg7: memref<1x32xf32, #tpu.memory_space<vmem>>, %arg8: memref<32x192xbf16, #tpu.memory_space<vmem>>, %arg9: memref<64x32xbf16, #tpu.memory_space<vmem>>, %arg10: memref<1x32xf32, #tpu.memory_space<vmem>>, %arg11: memref<1x32xf32, #tpu.memory_space<vmem>>, %arg12: memref<1x32xf32, #tpu.memory_space<vmem>>, %arg13: memref<32x128xbf16, #tpu.memory_space<vmem>>, %arg14: memref<1x128xf32, #tpu.memory_space<vmem>>, %arg15: memref<128x32xbf16, #tpu.memory_space<vmem>>, %arg16: memref<1x32xf32, #tpu.memory_space<vmem>>, %arg17: memref<1x32xf32, #tpu.memory_space<vmem>>, %arg18: memref<1x32xf32, #tpu.memory_space<vmem>>, %arg19: memref<1x1x32xf32, #tpu.memory_space<vmem>>) attributes {dimension_semantics = [#tpu.dimension_semantics<parallel>], iteration_bounds = array<i64: 2>, scalar_prefetch = 0 : i64, scratch_operands = 0 : i64, tpu.core_type = #tpu.core_type<tc>, window_params = [{transform_indices = @transform_0, window_bounds = array<i64: 1, 8, 256>}, {pipeline_mode = #tpu.pipeline_mode<synchronous>, transform_indices = @transform_1, window_bounds = array<i64: 256, 32>}, {pipeline_mode = #tpu.pipeline_mode<synchronous>, transform_indices = @transform_2, window_bounds = array<i64: 1, 32>}, {pipeline_mode = #tpu.pipeline_mode<synchronous>, transform_indices = @transform_3, window_bounds = array<i64: 1, 32>}, {pipeline_mode = #tpu.pipeline_mode<synchronous>, transform_indices = @transform_4, window_bounds = array<i64: 8, 32>}, {pipeline_mode = #tpu.pipeline_mode<synchronous>, transform_indices = @transform_5, window_bounds = array<i64: 1, 32>}, {pipeline_mode = #tpu.pipeline_mode<synchronous>, transform_indices = @transform_6, window_bounds = array<i64: 1, 32>}, {pipeline_mode = #tpu.pipeline_mode<synchronous>, transform_indices = @transform_7, window_bounds = array<i64: 32, 192>}, {pipeline_mode = #tpu.pipeline_mode<synchronous>, transform_indices = @transform_8, window_bounds = array<i64: 64, 32>}, {pipeline_mode = #tpu.pipeline_mode<synchronous>, transform_indices = @transform_9, window_bounds = array<i64: 1, 32>}, {pipeline_mode = #tpu.pipeline_mode<synchronous>, transform_indices = @transform_10, window_bounds = array<i64: 1, 32>}, {pipeline_mode = #tpu.pipeline_mode<synchronous>, transform_indices = @transform_11, window_bounds = array<i64: 1, 32>}, {pipeline_mode = #tpu.pipeline_mode<synchronous>, transform_indices = @transform_12, window_bounds = array<i64: 32, 128>}, {pipeline_mode = #tpu.pipeline_mode<synchronous>, transform_indices = @transform_13, window_bounds = array<i64: 1, 128>}, {pipeline_mode = #tpu.pipeline_mode<synchronous>, transform_indices = @transform_14, window_bounds = array<i64: 128, 32>}, {pipeline_mode = #tpu.pipeline_mode<synchronous>, transform_indices = @transform_15, window_bounds = array<i64: 1, 32>}, {pipeline_mode = #tpu.pipeline_mode<synchronous>, transform_indices = @transform_16, window_bounds = array<i64: 1, 32>}, {pipeline_mode = #tpu.pipeline_mode<synchronous>, transform_indices = @transform_17, window_bounds = array<i64: 1, 32>}, {transform_indices = @transform_18, window_bounds = array<i64: 1, 1, 32>}]} {
    %c0 = arith.constant 0 : index
    %c0_0 = arith.constant 0 : index
    %c0_1 = arith.constant 0 : index
    %0 = vector.load %arg1[%c0, %c0_0, %c0_1] : memref<1x8x256xbf16, #tpu.memory_space<vmem>>, vector<1x8x256xbf16>
    %1 = vector.shape_cast %0 : vector<1x8x256xbf16> to vector<8x256xbf16>
    %c0_2 = arith.constant 0 : index
    %c0_3 = arith.constant 0 : index
    %2 = vector.load %arg2[%c0_2, %c0_3] : memref<256x32xbf16, #tpu.memory_space<vmem>>, vector<256x32xbf16>
    %cst = arith.constant dense<0.000000e+00> : vector<8x32xf32>
    %3 = tpu.matmul %1, %2, %cst {dimension_numbers = #tpu.dot_dimension_numbers<[1], [0], [0], [1], [0, 0, 1, 1], [], []>} : vector<8x256xbf16>, vector<256x32xbf16>, vector<8x32xf32> -> vector<8x32xf32>
    %c0_4 = arith.constant 0 : index
    %c0_5 = arith.constant 0 : index
    %4 = vector.load %arg3[%c0_4, %c0_5] : memref<1x32xf32, #tpu.memory_space<vmem>>, vector<1x32xf32>
    %5 = vector.broadcast %4 : vector<1x32xf32> to vector<8x32xf32>
    %6 = arith.addf %3, %5 : vector<8x32xf32>
    %7 = tpu.iota {dimensions = array<i32: 0>} : vector<8x1xi32>
    %c0_i32 = arith.constant 0 : i32
    %8 = vector.broadcast %c0_i32 : i32 to vector<8x1xi32>
    %9 = arith.cmpi eq, %7, %8 : vector<8x1xi32>
    %c0_6 = arith.constant 0 : index
    %c0_7 = arith.constant 0 : index
    %10 = vector.load %arg4[%c0_6, %c0_7] : memref<1x32xf32, #tpu.memory_space<vmem>>, vector<1x32xf32>
    %11 = vector.shape_cast %9 : vector<8x1xi1> to vector<8x1xi1>
    %12 = vector.broadcast %11 : vector<8x1xi1> to vector<8x32xi1>
    %13 = vector.shape_cast %10 : vector<1x32xf32> to vector<1x32xf32>
    %14 = vector.broadcast %13 : vector<1x32xf32> to vector<8x32xf32>
    %15 = arith.select %12, %14, %6 : vector<8x32xi1>, vector<8x32xf32>
    %c0_8 = arith.constant 0 : index
    %c0_9 = arith.constant 0 : index
    %16 = vector.load %arg5[%c0_8, %c0_9] : memref<8x32xf32, #tpu.memory_space<vmem>>, vector<8x32xf32>
    %17 = arith.addf %15, %16 : vector<8x32xf32>
    %18 = tpu.iota {dimensions = array<i32: 1>} : vector<1x8xi32>
    %c5_i32 = arith.constant 5 : i32
    %19 = vector.broadcast %c5_i32 : i32 to vector<1x8xi32>
    %20 = arith.cmpi slt, %18, %19 : vector<1x8xi32>
    %cst_10 = arith.constant 0.000000e+00 : f32
    %cst_11 = arith.constant -1.000000e+30 : f32
    %21 = vector.broadcast %cst_10 : f32 to vector<1x8xf32>
    %22 = vector.broadcast %cst_11 : f32 to vector<1x8xf32>
    %23 = arith.select %20, %21, %22 : vector<1x8xi1>, vector<1x8xf32>
    %c0_12 = arith.constant 0 : index
    %c0_13 = arith.constant 0 : index
    %24 = vector.load %arg6[%c0_12, %c0_13] : memref<1x32xf32, #tpu.memory_space<vmem>>, vector<1x32xf32>
    %c0_14 = arith.constant 0 : index
    %c0_15 = arith.constant 0 : index
    %25 = vector.load %arg7[%c0_14, %c0_15] : memref<1x32xf32, #tpu.memory_space<vmem>>, vector<1x32xf32>
    %cst_16 = arith.constant dense<0.000000e+00> : vector<8xf32>
    %26 = vector.multi_reduction <add>, %17, %cst_16 [1] : vector<8x32xf32> to vector<8xf32>
    %27 = vector.shape_cast %26 : vector<8xf32> to vector<8x1xf32>
    %cst_17 = arith.constant 3.200000e+01 : f32
    %28 = vector.broadcast %cst_17 : f32 to vector<8x1xf32>
    %29 = arith.divf %27, %28 : vector<8x1xf32>
    %30 = vector.broadcast %29 : vector<8x1xf32> to vector<8x32xf32>
    %31 = arith.subf %17, %30 : vector<8x32xf32>
    %32 = arith.mulf %31, %31 : vector<8x32xf32>
    %cst_18 = arith.constant dense<0.000000e+00> : vector<8xf32>
    %33 = vector.multi_reduction <add>, %32, %cst_18 [1] : vector<8x32xf32> to vector<8xf32>
    %34 = vector.shape_cast %33 : vector<8xf32> to vector<8x1xf32>
    %cst_19 = arith.constant 3.200000e+01 : f32
    %35 = vector.broadcast %cst_19 : f32 to vector<8x1xf32>
    %36 = arith.divf %34, %35 : vector<8x1xf32>
    %37 = vector.broadcast %29 : vector<8x1xf32> to vector<8x32xf32>
    %38 = arith.subf %17, %37 : vector<8x32xf32>
    %cst_20 = arith.constant 9.99999974E-6 : f32
    %39 = vector.broadcast %cst_20 : f32 to vector<8x1xf32>
    %40 = arith.addf %36, %39 : vector<8x1xf32>
    %41 = math.rsqrt %40 : vector<8x1xf32>
    %42 = vector.broadcast %41 : vector<8x1xf32> to vector<8x32xf32>
    %43 = arith.mulf %38, %42 : vector<8x32xf32>
    %44 = vector.broadcast %24 : vector<1x32xf32> to vector<8x32xf32>
    %45 = arith.mulf %43, %44 : vector<8x32xf32>
    %46 = vector.broadcast %25 : vector<1x32xf32> to vector<8x32xf32>
    %47 = arith.addf %45, %46 : vector<8x32xf32>
    %48 = arith.truncf %47 : vector<8x32xf32> to vector<8x32xbf16>
    %c0_21 = arith.constant 0 : index
    %c0_22 = arith.constant 0 : index
    %49 = vector.load %arg8[%c0_21, %c0_22] : memref<32x192xbf16, #tpu.memory_space<vmem>>, vector<32x192xbf16>
    %cst_23 = arith.constant dense<0.000000e+00> : vector<8x192xf32>
    %50 = tpu.matmul %48, %49, %cst_23 {dimension_numbers = #tpu.dot_dimension_numbers<[1], [0], [0], [1], [0, 0, 1, 1], [], []>} : vector<8x32xbf16>, vector<32x192xbf16>, vector<8x192xf32> -> vector<8x192xf32>
    %51 = vector.extract_strided_slice %50 {offsets = [0, 0], sizes = [8, 16], strides = [1, 1]} : vector<8x192xf32> to vector<8x16xf32>
    %cst_24 = arith.constant 2.500000e-01 : f32
    %52 = vector.broadcast %cst_24 : f32 to vector<8x16xf32>
    %53 = arith.mulf %51, %52 : vector<8x16xf32>
    %54 = vector.extract_strided_slice %50 {offsets = [0, 64], sizes = [8, 16], strides = [1, 1]} : vector<8x192xf32> to vector<8x16xf32>
    %55 = vector.extract_strided_slice %50 {offsets = [0, 128], sizes = [8, 16], strides = [1, 1]} : vector<8x192xf32> to vector<8x16xf32>
    %56 = arith.truncf %53 : vector<8x16xf32> to vector<8x16xbf16>
    %57 = arith.truncf %54 : vector<8x16xf32> to vector<8x16xbf16>
    %cst_25 = arith.constant dense<0.000000e+00> : vector<8x8xf32>
    %58 = tpu.matmul %56, %57, %cst_25 {dimension_numbers = #tpu.dot_dimension_numbers<[1], [1], [0], [0], [0, 0, 1, 0], [], []>} : vector<8x16xbf16>, vector<8x16xbf16>, vector<8x8xf32> -> vector<8x8xf32>
    %59 = vector.broadcast %23 : vector<1x8xf32> to vector<8x8xf32>
    %60 = arith.addf %58, %59 : vector<8x8xf32>
    %cst_26 = arith.constant dense<0xFF800000> : vector<8xf32>
    %61 = vector.multi_reduction <maximumf>, %60, %cst_26 [1] : vector<8x8xf32> to vector<8xf32>
    %62 = vector.shape_cast %61 : vector<8xf32> to vector<8x1xf32>
    %63 = vector.broadcast %62 : vector<8x1xf32> to vector<8x8xf32>
    %64 = arith.subf %60, %63 : vector<8x8xf32>
    %65 = math.exp %64 : vector<8x8xf32>
    %cst_27 = arith.constant dense<0.000000e+00> : vector<8xf32>
    %66 = vector.multi_reduction <add>, %65, %cst_27 [1] : vector<8x8xf32> to vector<8xf32>
    %67 = vector.shape_cast %66 : vector<8xf32> to vector<8x1xf32>
    %68 = tpu.reciprocal %67 {approx = true} : vector<8x1xf32> -> vector<8x1xf32>
    %69 = vector.broadcast %68 : vector<8x1xf32> to vector<8x8xf32>
    %70 = arith.mulf %65, %69 : vector<8x8xf32>
    %71 = arith.truncf %70 : vector<8x8xf32> to vector<8x8xbf16>
    %72 = arith.truncf %55 : vector<8x16xf32> to vector<8x16xbf16>
    %cst_28 = arith.constant dense<0.000000e+00> : vector<8x16xf32>
    %73 = tpu.matmul %71, %72, %cst_28 {dimension_numbers = #tpu.dot_dimension_numbers<[1], [0], [0], [1], [0, 0, 1, 1], [], []>} : vector<8x8xbf16>, vector<8x16xbf16>, vector<8x16xf32> -> vector<8x16xf32>
    %74 = vector.extract_strided_slice %50 {offsets = [0, 16], sizes = [8, 16], strides = [1, 1]} : vector<8x192xf32> to vector<8x16xf32>
    %cst_29 = arith.constant 2.500000e-01 : f32
    %75 = vector.broadcast %cst_29 : f32 to vector<8x16xf32>
    %76 = arith.mulf %74, %75 : vector<8x16xf32>
    %77 = vector.extract_strided_slice %50 {offsets = [0, 80], sizes = [8, 16], strides = [1, 1]} : vector<8x192xf32> to vector<8x16xf32>
    %78 = vector.extract_strided_slice %50 {offsets = [0, 144], sizes = [8, 16], strides = [1, 1]} : vector<8x192xf32> to vector<8x16xf32>
    %79 = arith.truncf %76 : vector<8x16xf32> to vector<8x16xbf16>
    %80 = arith.truncf %77 : vector<8x16xf32> to vector<8x16xbf16>
    %cst_30 = arith.constant dense<0.000000e+00> : vector<8x8xf32>
    %81 = tpu.matmul %79, %80, %cst_30 {dimension_numbers = #tpu.dot_dimension_numbers<[1], [1], [0], [0], [0, 0, 1, 0], [], []>} : vector<8x16xbf16>, vector<8x16xbf16>, vector<8x8xf32> -> vector<8x8xf32>
    %82 = vector.broadcast %23 : vector<1x8xf32> to vector<8x8xf32>
    %83 = arith.addf %81, %82 : vector<8x8xf32>
    %cst_31 = arith.constant dense<0xFF800000> : vector<8xf32>
    %84 = vector.multi_reduction <maximumf>, %83, %cst_31 [1] : vector<8x8xf32> to vector<8xf32>
    %85 = vector.shape_cast %84 : vector<8xf32> to vector<8x1xf32>
    %86 = vector.broadcast %85 : vector<8x1xf32> to vector<8x8xf32>
    %87 = arith.subf %83, %86 : vector<8x8xf32>
    %88 = math.exp %87 : vector<8x8xf32>
    %cst_32 = arith.constant dense<0.000000e+00> : vector<8xf32>
    %89 = vector.multi_reduction <add>, %88, %cst_32 [1] : vector<8x8xf32> to vector<8xf32>
    %90 = vector.shape_cast %89 : vector<8xf32> to vector<8x1xf32>
    %91 = tpu.reciprocal %90 {approx = true} : vector<8x1xf32> -> vector<8x1xf32>
    %92 = vector.broadcast %91 : vector<8x1xf32> to vector<8x8xf32>
    %93 = arith.mulf %88, %92 : vector<8x8xf32>
    %94 = arith.truncf %93 : vector<8x8xf32> to vector<8x8xbf16>
    %95 = arith.truncf %78 : vector<8x16xf32> to vector<8x16xbf16>
    %cst_33 = arith.constant dense<0.000000e+00> : vector<8x16xf32>
    %96 = tpu.matmul %94, %95, %cst_33 {dimension_numbers = #tpu.dot_dimension_numbers<[1], [0], [0], [1], [0, 0, 1, 1], [], []>} : vector<8x8xbf16>, vector<8x16xbf16>, vector<8x16xf32> -> vector<8x16xf32>
    %97 = vector.extract_strided_slice %50 {offsets = [0, 32], sizes = [8, 16], strides = [1, 1]} : vector<8x192xf32> to vector<8x16xf32>
    %cst_34 = arith.constant 2.500000e-01 : f32
    %98 = vector.broadcast %cst_34 : f32 to vector<8x16xf32>
    %99 = arith.mulf %97, %98 : vector<8x16xf32>
    %100 = vector.extract_strided_slice %50 {offsets = [0, 96], sizes = [8, 16], strides = [1, 1]} : vector<8x192xf32> to vector<8x16xf32>
    %101 = vector.extract_strided_slice %50 {offsets = [0, 160], sizes = [8, 16], strides = [1, 1]} : vector<8x192xf32> to vector<8x16xf32>
    %102 = arith.truncf %99 : vector<8x16xf32> to vector<8x16xbf16>
    %103 = arith.truncf %100 : vector<8x16xf32> to vector<8x16xbf16>
    %cst_35 = arith.constant dense<0.000000e+00> : vector<8x8xf32>
    %104 = tpu.matmul %102, %103, %cst_35 {dimension_numbers = #tpu.dot_dimension_numbers<[1], [1], [0], [0], [0, 0, 1, 0], [], []>} : vector<8x16xbf16>, vector<8x16xbf16>, vector<8x8xf32> -> vector<8x8xf32>
    %105 = vector.broadcast %23 : vector<1x8xf32> to vector<8x8xf32>
    %106 = arith.addf %104, %105 : vector<8x8xf32>
    %cst_36 = arith.constant dense<0xFF800000> : vector<8xf32>
    %107 = vector.multi_reduction <maximumf>, %106, %cst_36 [1] : vector<8x8xf32> to vector<8xf32>
    %108 = vector.shape_cast %107 : vector<8xf32> to vector<8x1xf32>
    %109 = vector.broadcast %108 : vector<8x1xf32> to vector<8x8xf32>
    %110 = arith.subf %106, %109 : vector<8x8xf32>
    %111 = math.exp %110 : vector<8x8xf32>
    %cst_37 = arith.constant dense<0.000000e+00> : vector<8xf32>
    %112 = vector.multi_reduction <add>, %111, %cst_37 [1] : vector<8x8xf32> to vector<8xf32>
    %113 = vector.shape_cast %112 : vector<8xf32> to vector<8x1xf32>
    %114 = tpu.reciprocal %113 {approx = true} : vector<8x1xf32> -> vector<8x1xf32>
    %115 = vector.broadcast %114 : vector<8x1xf32> to vector<8x8xf32>
    %116 = arith.mulf %111, %115 : vector<8x8xf32>
    %117 = arith.truncf %116 : vector<8x8xf32> to vector<8x8xbf16>
    %118 = arith.truncf %101 : vector<8x16xf32> to vector<8x16xbf16>
    %cst_38 = arith.constant dense<0.000000e+00> : vector<8x16xf32>
    %119 = tpu.matmul %117, %118, %cst_38 {dimension_numbers = #tpu.dot_dimension_numbers<[1], [0], [0], [1], [0, 0, 1, 1], [], []>} : vector<8x8xbf16>, vector<8x16xbf16>, vector<8x16xf32> -> vector<8x16xf32>
    %120 = vector.extract_strided_slice %50 {offsets = [0, 48], sizes = [8, 16], strides = [1, 1]} : vector<8x192xf32> to vector<8x16xf32>
    %cst_39 = arith.constant 2.500000e-01 : f32
    %121 = vector.broadcast %cst_39 : f32 to vector<8x16xf32>
    %122 = arith.mulf %120, %121 : vector<8x16xf32>
    %123 = vector.extract_strided_slice %50 {offsets = [0, 112], sizes = [8, 16], strides = [1, 1]} : vector<8x192xf32> to vector<8x16xf32>
    %124 = vector.extract_strided_slice %50 {offsets = [0, 176], sizes = [8, 16], strides = [1, 1]} : vector<8x192xf32> to vector<8x16xf32>
    %125 = arith.truncf %122 : vector<8x16xf32> to vector<8x16xbf16>
    %126 = arith.truncf %123 : vector<8x16xf32> to vector<8x16xbf16>
    %cst_40 = arith.constant dense<0.000000e+00> : vector<8x8xf32>
    %127 = tpu.matmul %125, %126, %cst_40 {dimension_numbers = #tpu.dot_dimension_numbers<[1], [1], [0], [0], [0, 0, 1, 0], [], []>} : vector<8x16xbf16>, vector<8x16xbf16>, vector<8x8xf32> -> vector<8x8xf32>
    %128 = vector.broadcast %23 : vector<1x8xf32> to vector<8x8xf32>
    %129 = arith.addf %127, %128 : vector<8x8xf32>
    %cst_41 = arith.constant dense<0xFF800000> : vector<8xf32>
    %130 = vector.multi_reduction <maximumf>, %129, %cst_41 [1] : vector<8x8xf32> to vector<8xf32>
    %131 = vector.shape_cast %130 : vector<8xf32> to vector<8x1xf32>
    %132 = vector.broadcast %131 : vector<8x1xf32> to vector<8x8xf32>
    %133 = arith.subf %129, %132 : vector<8x8xf32>
    %134 = math.exp %133 : vector<8x8xf32>
    %cst_42 = arith.constant dense<0.000000e+00> : vector<8xf32>
    %135 = vector.multi_reduction <add>, %134, %cst_42 [1] : vector<8x8xf32> to vector<8xf32>
    %136 = vector.shape_cast %135 : vector<8xf32> to vector<8x1xf32>
    %137 = tpu.reciprocal %136 {approx = true} : vector<8x1xf32> -> vector<8x1xf32>
    %138 = vector.broadcast %137 : vector<8x1xf32> to vector<8x8xf32>
    %139 = arith.mulf %134, %138 : vector<8x8xf32>
    %140 = arith.truncf %139 : vector<8x8xf32> to vector<8x8xbf16>
    %141 = arith.truncf %124 : vector<8x16xf32> to vector<8x16xbf16>
    %cst_43 = arith.constant dense<0.000000e+00> : vector<8x16xf32>
    %142 = tpu.matmul %140, %141, %cst_43 {dimension_numbers = #tpu.dot_dimension_numbers<[1], [0], [0], [1], [0, 0, 1, 1], [], []>} : vector<8x8xbf16>, vector<8x16xbf16>, vector<8x16xf32> -> vector<8x16xf32>
    %143 = tpu.concatenate %73, %96, %119, %142 in 1 : vector<8x16xf32>, vector<8x16xf32>, vector<8x16xf32>, vector<8x16xf32> -> vector<8x64xf32>
    %144 = arith.truncf %143 : vector<8x64xf32> to vector<8x64xbf16>
    %c0_44 = arith.constant 0 : index
    %c0_45 = arith.constant 0 : index
    %145 = vector.load %arg9[%c0_44, %c0_45] : memref<64x32xbf16, #tpu.memory_space<vmem>>, vector<64x32xbf16>
    %cst_46 = arith.constant dense<0.000000e+00> : vector<8x32xf32>
    %146 = tpu.matmul %144, %145, %cst_46 {dimension_numbers = #tpu.dot_dimension_numbers<[1], [0], [0], [1], [0, 0, 1, 1], [], []>} : vector<8x64xbf16>, vector<64x32xbf16>, vector<8x32xf32> -> vector<8x32xf32>
    %c0_47 = arith.constant 0 : index
    %c0_48 = arith.constant 0 : index
    %147 = vector.load %arg10[%c0_47, %c0_48] : memref<1x32xf32, #tpu.memory_space<vmem>>, vector<1x32xf32>
    %148 = vector.broadcast %147 : vector<1x32xf32> to vector<8x32xf32>
    %149 = arith.addf %146, %148 : vector<8x32xf32>
    %150 = arith.addf %17, %149 : vector<8x32xf32>
    %c0_49 = arith.constant 0 : index
    %c0_50 = arith.constant 0 : index
    %151 = vector.load %arg11[%c0_49, %c0_50] : memref<1x32xf32, #tpu.memory_space<vmem>>, vector<1x32xf32>
    %c0_51 = arith.constant 0 : index
    %c0_52 = arith.constant 0 : index
    %152 = vector.load %arg12[%c0_51, %c0_52] : memref<1x32xf32, #tpu.memory_space<vmem>>, vector<1x32xf32>
    %cst_53 = arith.constant dense<0.000000e+00> : vector<8xf32>
    %153 = vector.multi_reduction <add>, %150, %cst_53 [1] : vector<8x32xf32> to vector<8xf32>
    %154 = vector.shape_cast %153 : vector<8xf32> to vector<8x1xf32>
    %cst_54 = arith.constant 3.200000e+01 : f32
    %155 = vector.broadcast %cst_54 : f32 to vector<8x1xf32>
    %156 = arith.divf %154, %155 : vector<8x1xf32>
    %157 = vector.broadcast %156 : vector<8x1xf32> to vector<8x32xf32>
    %158 = arith.subf %150, %157 : vector<8x32xf32>
    %159 = arith.mulf %158, %158 : vector<8x32xf32>
    %cst_55 = arith.constant dense<0.000000e+00> : vector<8xf32>
    %160 = vector.multi_reduction <add>, %159, %cst_55 [1] : vector<8x32xf32> to vector<8xf32>
    %161 = vector.shape_cast %160 : vector<8xf32> to vector<8x1xf32>
    %cst_56 = arith.constant 3.200000e+01 : f32
    %162 = vector.broadcast %cst_56 : f32 to vector<8x1xf32>
    %163 = arith.divf %161, %162 : vector<8x1xf32>
    %164 = vector.broadcast %156 : vector<8x1xf32> to vector<8x32xf32>
    %165 = arith.subf %150, %164 : vector<8x32xf32>
    %cst_57 = arith.constant 9.99999974E-6 : f32
    %166 = vector.broadcast %cst_57 : f32 to vector<8x1xf32>
    %167 = arith.addf %163, %166 : vector<8x1xf32>
    %168 = math.rsqrt %167 : vector<8x1xf32>
    %169 = vector.broadcast %168 : vector<8x1xf32> to vector<8x32xf32>
    %170 = arith.mulf %165, %169 : vector<8x32xf32>
    %171 = vector.broadcast %151 : vector<1x32xf32> to vector<8x32xf32>
    %172 = arith.mulf %170, %171 : vector<8x32xf32>
    %173 = vector.broadcast %152 : vector<1x32xf32> to vector<8x32xf32>
    %174 = arith.addf %172, %173 : vector<8x32xf32>
    %175 = arith.truncf %174 : vector<8x32xf32> to vector<8x32xbf16>
    %c0_58 = arith.constant 0 : index
    %c0_59 = arith.constant 0 : index
    %176 = vector.load %arg13[%c0_58, %c0_59] : memref<32x128xbf16, #tpu.memory_space<vmem>>, vector<32x128xbf16>
    %cst_60 = arith.constant dense<0.000000e+00> : vector<8x128xf32>
    %177 = tpu.matmul %175, %176, %cst_60 {dimension_numbers = #tpu.dot_dimension_numbers<[1], [0], [0], [1], [0, 0, 1, 1], [], []>} : vector<8x32xbf16>, vector<32x128xbf16>, vector<8x128xf32> -> vector<8x128xf32>
    %c0_61 = arith.constant 0 : index
    %c0_62 = arith.constant 0 : index
    %178 = vector.load %arg14[%c0_61, %c0_62] : memref<1x128xf32, #tpu.memory_space<vmem>>, vector<1x128xf32>
    %179 = vector.broadcast %178 : vector<1x128xf32> to vector<8x128xf32>
    %180 = arith.addf %177, %179 : vector<8x128xf32>
    %181 = arith.mulf %180, %180 : vector<8x128xf32>
    %182 = arith.mulf %180, %181 : vector<8x128xf32>
    %cst_63 = arith.constant 4.471500e-02 : f32
    %183 = vector.broadcast %cst_63 : f32 to vector<8x128xf32>
    %184 = arith.mulf %183, %182 : vector<8x128xf32>
    %185 = arith.addf %180, %184 : vector<8x128xf32>
    %cst_64 = arith.constant 0.797884583 : f32
    %186 = vector.broadcast %cst_64 : f32 to vector<8x128xf32>
    %187 = arith.mulf %186, %185 : vector<8x128xf32>
    %188 = math.tanh %187 : vector<8x128xf32>
    %cst_65 = arith.constant 1.000000e+00 : f32
    %189 = vector.broadcast %cst_65 : f32 to vector<8x128xf32>
    %190 = arith.addf %189, %188 : vector<8x128xf32>
    %cst_66 = arith.constant 5.000000e-01 : f32
    %191 = vector.broadcast %cst_66 : f32 to vector<8x128xf32>
    %192 = arith.mulf %191, %190 : vector<8x128xf32>
    %193 = arith.mulf %180, %192 : vector<8x128xf32>
    %194 = arith.truncf %193 : vector<8x128xf32> to vector<8x128xbf16>
    %c0_67 = arith.constant 0 : index
    %c0_68 = arith.constant 0 : index
    %195 = vector.load %arg15[%c0_67, %c0_68] : memref<128x32xbf16, #tpu.memory_space<vmem>>, vector<128x32xbf16>
    %cst_69 = arith.constant dense<0.000000e+00> : vector<8x32xf32>
    %196 = tpu.matmul %194, %195, %cst_69 {dimension_numbers = #tpu.dot_dimension_numbers<[1], [0], [0], [1], [0, 0, 1, 1], [], []>} : vector<8x128xbf16>, vector<128x32xbf16>, vector<8x32xf32> -> vector<8x32xf32>
    %c0_70 = arith.constant 0 : index
    %c0_71 = arith.constant 0 : index
    %197 = vector.load %arg16[%c0_70, %c0_71] : memref<1x32xf32, #tpu.memory_space<vmem>>, vector<1x32xf32>
    %198 = vector.broadcast %197 : vector<1x32xf32> to vector<8x32xf32>
    %199 = arith.addf %196, %198 : vector<8x32xf32>
    %200 = arith.addf %150, %199 : vector<8x32xf32>
    %c0_72 = arith.constant 0 : index
    %c0_73 = arith.constant 0 : index
    %201 = vector.load %arg17[%c0_72, %c0_73] : memref<1x32xf32, #tpu.memory_space<vmem>>, vector<1x32xf32>
    %c0_74 = arith.constant 0 : index
    %c0_75 = arith.constant 0 : index
    %202 = vector.load %arg18[%c0_74, %c0_75] : memref<1x32xf32, #tpu.memory_space<vmem>>, vector<1x32xf32>
    %cst_76 = arith.constant dense<0.000000e+00> : vector<8xf32>
    %203 = vector.multi_reduction <add>, %200, %cst_76 [1] : vector<8x32xf32> to vector<8xf32>
    %204 = vector.shape_cast %203 : vector<8xf32> to vector<8x1xf32>
    %cst_77 = arith.constant 3.200000e+01 : f32
    %205 = vector.broadcast %cst_77 : f32 to vector<8x1xf32>
    %206 = arith.divf %204, %205 : vector<8x1xf32>
    %207 = vector.broadcast %206 : vector<8x1xf32> to vector<8x32xf32>
    %208 = arith.subf %200, %207 : vector<8x32xf32>
    %209 = arith.mulf %208, %208 : vector<8x32xf32>
    %cst_78 = arith.constant dense<0.000000e+00> : vector<8xf32>
    %210 = vector.multi_reduction <add>, %209, %cst_78 [1] : vector<8x32xf32> to vector<8xf32>
    %211 = vector.shape_cast %210 : vector<8xf32> to vector<8x1xf32>
    %cst_79 = arith.constant 3.200000e+01 : f32
    %212 = vector.broadcast %cst_79 : f32 to vector<8x1xf32>
    %213 = arith.divf %211, %212 : vector<8x1xf32>
    %214 = vector.broadcast %206 : vector<8x1xf32> to vector<8x32xf32>
    %215 = arith.subf %200, %214 : vector<8x32xf32>
    %cst_80 = arith.constant 9.99999974E-6 : f32
    %216 = vector.broadcast %cst_80 : f32 to vector<8x1xf32>
    %217 = arith.addf %213, %216 : vector<8x1xf32>
    %218 = math.rsqrt %217 : vector<8x1xf32>
    %219 = vector.broadcast %218 : vector<8x1xf32> to vector<8x32xf32>
    %220 = arith.mulf %215, %219 : vector<8x32xf32>
    %221 = vector.broadcast %201 : vector<1x32xf32> to vector<8x32xf32>
    %222 = arith.mulf %220, %221 : vector<8x32xf32>
    %223 = vector.broadcast %202 : vector<1x32xf32> to vector<8x32xf32>
    %224 = arith.addf %222, %223 : vector<8x32xf32>
    %225 = vector.extract_strided_slice %224 {offsets = [0, 0], sizes = [1, 32], strides = [1, 1]} : vector<8x32xf32> to vector<1x32xf32>
    %c0_81 = arith.constant 0 : index
    %c0_82 = arith.constant 0 : index
    %c0_83 = arith.constant 0 : index
    %226 = vector.load %arg19[%c0_81, %c0_82, %c0_83] : memref<1x1x32xf32, #tpu.memory_space<vmem>>, vector<1x1x32xf32>
    %227 = vector.shape_cast %226 : vector<1x1x32xf32> to vector<1x32xf32>
    %228 = vector.shape_cast %225 : vector<1x32xf32> to vector<1x1x32xf32>
    tpu.vector_store %arg19[%c0_81, %c0_82, %c0_83], %228 {strides = array<i32>} : memref<1x1x32xf32, #tpu.memory_space<vmem>>, vector<1x1x32xf32>,
    return
  }
  func.func @transform_0(%arg0: i32) -> (i32, i32, i32) {
    %c0_i32 = arith.constant 0 : i32
    %c0_i32_0 = arith.constant 0 : i32
    %c0_i32_1 = arith.constant 0 : i32
    return %arg0, %c0_i32, %c0_i32_0 : i32, i32, i32
  }
  func.func @transform_1(%arg0: i32) -> (i32, i32) {
    %c0_i32 = arith.constant 0 : i32
    %c0_i32_0 = arith.constant 0 : i32
    %c0_i32_1 = arith.constant 0 : i32
    return %c0_i32, %c0_i32_0 : i32, i32
  }
  func.func @transform_2(%arg0: i32) -> (i32, i32) {
    %c0_i32 = arith.constant 0 : i32
    %c0_i32_0 = arith.constant 0 : i32
    %c0_i32_1 = arith.constant 0 : i32
    return %c0_i32, %c0_i32_0 : i32, i32
  }
  func.func @transform_3(%arg0: i32) -> (i32, i32) {
    %c0_i32 = arith.constant 0 : i32
    %c0_i32_0 = arith.constant 0 : i32
    %c0_i32_1 = arith.constant 0 : i32
    return %c0_i32, %c0_i32_0 : i32, i32
  }
  func.func @transform_4(%arg0: i32) -> (i32, i32) {
    %c0_i32 = arith.constant 0 : i32
    %c0_i32_0 = arith.constant 0 : i32
    %c0_i32_1 = arith.constant 0 : i32
    return %c0_i32, %c0_i32_0 : i32, i32
  }
  func.func @transform_5(%arg0: i32) -> (i32, i32) {
    %c0_i32 = arith.constant 0 : i32
    %c0_i32_0 = arith.constant 0 : i32
    %c0_i32_1 = arith.constant 0 : i32
    return %c0_i32, %c0_i32_0 : i32, i32
  }
  func.func @transform_6(%arg0: i32) -> (i32, i32) {
    %c0_i32 = arith.constant 0 : i32
    %c0_i32_0 = arith.constant 0 : i32
    %c0_i32_1 = arith.constant 0 : i32
    return %c0_i32, %c0_i32_0 : i32, i32
  }
  func.func @transform_7(%arg0: i32) -> (i32, i32) {
    %c0_i32 = arith.constant 0 : i32
    %c0_i32_0 = arith.constant 0 : i32
    %c0_i32_1 = arith.constant 0 : i32
    return %c0_i32, %c0_i32_0 : i32, i32
  }
  func.func @transform_8(%arg0: i32) -> (i32, i32) {
    %c0_i32 = arith.constant 0 : i32
    %c0_i32_0 = arith.constant 0 : i32
    %c0_i32_1 = arith.constant 0 : i32
    return %c0_i32, %c0_i32_0 : i32, i32
  }
  func.func @transform_9(%arg0: i32) -> (i32, i32) {
    %c0_i32 = arith.constant 0 : i32
    %c0_i32_0 = arith.constant 0 : i32
    %c0_i32_1 = arith.constant 0 : i32
    return %c0_i32, %c0_i32_0 : i32, i32
  }
  func.func @transform_10(%arg0: i32) -> (i32, i32) {
    %c0_i32 = arith.constant 0 : i32
    %c0_i32_0 = arith.constant 0 : i32
    %c0_i32_1 = arith.constant 0 : i32
    return %c0_i32, %c0_i32_0 : i32, i32
  }
  func.func @transform_11(%arg0: i32) -> (i32, i32) {
    %c0_i32 = arith.constant 0 : i32
    %c0_i32_0 = arith.constant 0 : i32
    %c0_i32_1 = arith.constant 0 : i32
    return %c0_i32, %c0_i32_0 : i32, i32
  }
  func.func @transform_12(%arg0: i32) -> (i32, i32) {
    %c0_i32 = arith.constant 0 : i32
    %c0_i32_0 = arith.constant 0 : i32
    %c0_i32_1 = arith.constant 0 : i32
    return %c0_i32, %c0_i32_0 : i32, i32
  }
  func.func @transform_13(%arg0: i32) -> (i32, i32) {
    %c0_i32 = arith.constant 0 : i32
    %c0_i32_0 = arith.constant 0 : i32
    %c0_i32_1 = arith.constant 0 : i32
    return %c0_i32, %c0_i32_0 : i32, i32
  }
  func.func @transform_14(%arg0: i32) -> (i32, i32) {
    %c0_i32 = arith.constant 0 : i32
    %c0_i32_0 = arith.constant 0 : i32
    %c0_i32_1 = arith.constant 0 : i32
    return %c0_i32, %c0_i32_0 : i32, i32
  }
  func.func @transform_15(%arg0: i32) -> (i32, i32) {
    %c0_i32 = arith.constant 0 : i32
    %c0_i32_0 = arith.constant 0 : i32
    %c0_i32_1 = arith.constant 0 : i32
    return %c0_i32, %c0_i32_0 : i32, i32
  }
  func.func @transform_16(%arg0: i32) -> (i32, i32) {
    %c0_i32 = arith.constant 0 : i32
    %c0_i32_0 = arith.constant 0 : i32
    %c0_i32_1 = arith.constant 0 : i32
    return %c0_i32, %c0_i32_0 : i32, i32
  }
  func.func @transform_17(%arg0: i32) -> (i32, i32) {
    %c0_i32 = arith.constant 0 : i32
    %c0_i32_0 = arith.constant 0 : i32
    %c0_i32_1 = arith.constant 0 : i32
    return %c0_i32, %c0_i32_0 : i32, i32
  }
  func.func @transform_18(%arg0: i32) -> (i32, i32, i32) {
    %c0_i32 = arith.constant 0 : i32
    %c0_i32_0 = arith.constant 0 : i32
    %c0_i32_1 = arith.constant 0 : i32
    return %arg0, %c0_i32, %c0_i32_0 : i32, i32, i32
  }
}

</mosaic_0001>

<bundles_post_ra>
// kernel: tpu_custom_call.1
= control target key start
LH: loop header
LB: loop body
LE: loop exit
PB: predicated region body
PF: predicated region fallthrough
CT: control target
= control target key end

     0   :  { %s2597_s0 = inlined_call_operand.vmem [shape: bf16[2,8,256], index: 0, kind: input, shape index: {}]   ;;  %s2598_s1 = inlined_call_operand.vmem [shape: bf16[256,32], index: 1, kind: input, shape index: {}]   ;;  %s2599_s2 = inlined_call_operand.vmem [shape: f32[1,32], index: 2, kind: input, shape index: {}]   ;;  %s2600_s3 = inlined_call_operand.vmem [shape: f32[1,32], index: 3, kind: input, shape index: {}]   ;;  %s2601_s4 = inlined_call_operand.vmem [shape: f32[8,32], index: 4, kind: input, shape index: {}]   ;;  %s2602_s5 = inlined_call_operand.vmem [shape: f32[1,32], index: 5, kind: input, shape index: {}]   ;;  %s2603_s6 = inlined_call_operand.vmem [shape: f32[1,32], index: 6, kind: input, shape index: {}]   ;;  %s2604_s7 = inlined_call_operand.vmem [shape: bf16[32,192], index: 7, kind: input, shape index: {}]   ;;  %s2605_s8 = inlined_call_operand.vmem [shape: bf16[64,32], index: 8, kind: input, shape index: {}]   ;;  %s2606_s9 = inlined_call_operand.vmem [shape: f32[1,32], index: 9, kind: input, shape index: {}]   ;;  %s2607_s10 = inlined_call_operand.vmem [shape: f32[1,32], index: 10, kind: input, shape index: {}]   ;;  %s2608_s11 = inlined_call_operand.vmem [shape: f32[1,32], index: 11, kind: input, shape index: {}]   ;;  %s2609_s12 = inlined_call_operand.vmem [shape: bf16[32,128], index: 12, kind: input, shape index: {}]   ;;  %s2610_s13 = inlined_call_operand.vmem [shape: f32[1,128], index: 13, kind: input, shape index: {}]   ;;  %s2611_s14 = inlined_call_operand.vmem [shape: bf16[128,32], index: 14, kind: input, shape index: {}]   ;;  %s2612_s15 = inlined_call_operand.vmem [shape: f32[1,32], index: 15, kind: input, shape index: {}]   ;;  %s2613_s16 = inlined_call_operand.vmem [shape: f32[1,32], index: 16, kind: input, shape index: {}]   ;;  %s2614_s17 = inlined_call_operand.vmem [shape: f32[1,32], index: 17, kind: input, shape index: {}]   ;;  %s2615_s18 = inlined_call_operand.hbm [shape: f32[2,1,32], index: 18, kind: output, shape index: {}]  }
   0x1   :  { %2626 = sst [smem:[#allocation12_spill]] %s2597_s0 }
   0x2   :  { %2627 = sst [smem:[#allocation13_spill]] %s2598_s1 }
   0x3   :  { %2628 = sst [smem:[#allocation14_spill]] %s2599_s2 }
   0x4   :  { %2629 = sst [smem:[#allocation15_spill]] %s2614_s17 }
   0x5   :  { %2630 = sst [smem:[#allocation16_spill]] %s2615_s18 }
   0x6   :  { %23 = vsyncpa [#allocation3], 0 }
   0x7   :  { %25 = vsyncpa [#allocation3 + $0x1], 0  ;;  %s2234_s27 = smov 0   ;;  %s2236_s28 = smov 0  }
   0x8   :  { %s2238_s29 = smov 0   ;;  %s2240_s30 = smov 0  }
   0x9 LB: > { %2631 = sst [smem:[#allocation5_spill]] %s2113_s27  ;;  %s2255_s0 = sadd.s32 4294967295, %s2125_s30   ;;  %s2125_s30 = sphi %s2240_s30, %s2649_s30   ;;  %s2121_s29 = sphi %s2238_s29, %s2651_s29   ;;  %s2117_s28 = sphi %s2236_s28, %s2653_s28   ;;  %s2113_s27 = sphi %s2234_s27, %s2652_s27  }
   0xa   : > { %2632 = sst [smem:[#allocation6_spill]] %s2121_s29  ;;  %s1740_s19 = sadd.s32 4294967294, %s2125_s30  }
   0xb   : > { %2633 = sst [smem:[#allocation7_spill]] %s2125_s30  ;;  %s2259_s1 = sadd.s32 1, %s2125_s30  }
   0xc   : > { %2634 = sst [smem:[#allocation8_spill]] %s2259_s1  ;;  %s421_s20 = sadd.s32 1, %s2121_s29 }
   0xd   : > { %s418_s21 = ssub.s32 %s2125_s30, %s2259_s1  ;;  %p431_p0 = scmp.ne.s32.totalorder %s2121_s29, %s2117_s28 }
   0xe   : > { %p419_p1 = scmp.eq.s32.totalorder %s418_s21, 0  ;;  %p432_p2 = scmp.eq.s32.totalorder %s2255_s0, 1 }
   0xf   : > { %p437_p3 = scmp.ne.s32.totalorder %s2117_s28, %s2113_s27  ;;  %p438_p4 = scmp.eq.s32.totalorder %s1740_s19, 1 }
  0x10   : > { %s2270_s22 = scalar_select %p419_p1, %s2121_s29, %s421_s20  }
  0x11   : > { %p2272_p5 = por %p432_p2, %p431_p0  ;;  %p2276_p6 = por %p438_p4, %p437_p3 }
  0x12   : > { %2635 = sst [smem:[#allocation9_spill]] %s2270_s22  ;;  %p1743_p7 = scmp.ge.s32.totalorder %s2125_s30, 1 }
  0x13   : > { %s2636_s2 = scalar_select %p2272_p5, 1, 0 }
  0x14   : > { %s2638_s23 = scalar_select %p2276_p6, 1, 0 }
  0x15   : > { %2637 = sst [smem:[#allocation10_spill]] %s2636_s2  ;;  %p515_p8 = scmp.lt.s32.totalorder %s2125_s30, 3 }
  0x16   : > { %2639 = sst [smem:[#allocation11_spill]] %s2638_s23 }
  0x17   : > { %p516_p9 = pnand %p1743_p7, %p515_p8 }
  0x18   : > { %s2640_s26 = sld [smem:[#allocation13_spill]] (!%p516_p9)  ;;  %p568_p10 = scmp.lt.s32.totalorder (!%p516_p9), %s2255_s0, 1  ;;  %v757_v19 = vlaneseq (!%p516_p9)  ;;  %v1765_v27 = vld [vmem:[%s2600_s3] ss:$0 sm:$0xff] (!%p516_p9)  ;;  %vm778_vm1 = vcmask (!%p516_p9), 261120   ;;  %v2127_v41 = vmov (!%p516_p9), 0  }
  0x19   : > { %519 = sbr.rel (%p516_p9) target bundleno = 4726 (0x1276), region = 92  ;;  %s2641_s19 = sld [smem:[#allocation12_spill]] (!%p516_p9)  ;;  %v770_v29 = vld [vmem:[%s2601_s4] sm:$0xff] (!%p516_p9)  ;;  %v2022_v40 = vld [vmem:[%s2604_s7 + $0x14] ss:$8 sps:$4 sm:$0xff] (!%p516_p9)   ;;  %867 = vmatprep.mubr.bf16.mxu1 (!%p516_p9), %v2127_v41  ;;  %v2128_v53 = vmov (!%p516_p9), 0.0  }
  0x1a   : > { %v758_v20 = vshrl.u32 (!%p516_p9), %v757_v19, 7  ;;  %v2019_v38 = vld [vmem:[%s2604_s7 + $0x4] ss:$8 sps:$4 sm:$0xff] (!%p516_p9)   ;;  %v2021_v39 = vld [vmem:[%s2604_s7] ss:$8 sps:$4 sm:$0xff] (!%p516_p9)   ;;  %vm2129_vm2 = vmmov (!%p516_p9), 0  }
  0x1b   : > { %835 = vmatprep.subr.bf16.mxu1 (!%p516_p9), %v2019_v38  ;;  %v2024_v42 = vld [vmem:[%s2604_s7 + $0x10] ss:$8 sps:$4 sm:$0xff] (!%p516_p9)   ;;  %v1766_v47 = vld [vmem:[%s2602_s5] ss:$0 sm:$0xff] (!%p516_p9)  ;;  %s2130_s29 = smov (!%p516_p9), 64   ;;  %vm882_vm3 = vcmask (!%p516_p9), 130048  }
  0x1c   : > { %vm759_vm0 = vcmp.eq.s32.totalorder (!%p516_p9), %v758_v20, 0  ;;  %836 = vmatpush1.bf16.msra.mxu1 (!%p516_p9), %v2021_v39  ;;  %v1767_v49 = vld [vmem:[%s2603_s6] ss:$0 sm:$0xff] (!%p516_p9)  ;;  %vm946_vm4 = vcmask (!%p516_p9), 1043456   ;;  %vm929_vm6 = vcmask (!%p516_p9), 64512   ;;  %s2132_s1 = smov (!%p516_p9), 112  }
  0x1d   : > { %837 = vmatprep.subr.bf16.mxu1 (!%p516_p9), %v2022_v40  ;;  %s2133_s24 = smov (!%p516_p9), 48   ;;  %s2134_s17 = smov (!%p516_p9), 32   ;;  %vm1336_vm7 = vcmask (!%p516_p9), 392192   ;;  %vm1378_vm8 = vcmask (!%p516_p9), 523264   ;;  %vm1670_vm9 = vcmask (!%p516_p9), 253952  }
  0x1e   : > { %v2001_v0 = vld [vmem:[%s2640_s26 + $0x40] sm:$0xff] (!%p516_p9)   ;;  %v2003_v2 = vld [vmem:[%s2640_s26 + $0x48] sm:$0xff] (!%p516_p9)   ;;  %v2005_v4 = vld [vmem:[%s2640_s26 + $0x50] sm:$0xff] (!%p516_p9)   ;;  %s2135_s18 = smov (!%p516_p9), 96   ;;  %s2137_s30 = smov (!%p516_p9), 80  }
  0x1f   : > { %v2002_v1 = vld [vmem:[%s2640_s26] sm:$0xff] (!%p516_p9)   ;;  %1808 = vmatprep.subr.bf16.mxu0 (!%p516_p9), %v2001_v0  ;;  %v2004_v3 = vld [vmem:[%s2640_s26 + $0x8] sm:$0xff] (!%p516_p9)   ;;  %v2006_v5 = vld [vmem:[%s2640_s26 + $0x10] sm:$0xff] (!%p516_p9)  }
  0x20   : > { %1809 = vmatpush3.bf16.msra.mxu0 %v2002_v1  ;;  %s569_s23 = scalar_select %p568_p10, %s2255_s0, 1  ;;  %v2007_v6 = vld [vmem:[%s2640_s26 + $0x58] sm:$0xff]   ;;  %v2009_v8 = vld [vmem:[%s2640_s26 + $0x60] sm:$0xff]   ;;  %v2011_v10 = vld [vmem:[%s2640_s26 + $0x68] sm:$0xff]   ;;  %838 = vmatpush1.bf16.msra.mxu1 %v2024_v42  ;;  %v773_v1 = vand.u32 127, %v757_v19 }
  0x21   : > { %1810 = vmatprep.subr.bf16.mxu0 %v2003_v2  ;;  %v2008_v7 = vld [vmem:[%s2640_s26 + $0x18] sm:$0xff]   ;;  %v2010_v9 = vld [vmem:[%s2640_s26 + $0x20] sm:$0xff]   ;;  %v2012_v12 = vld [vmem:[%s2640_s26 + $0x28] sm:$0xff]   ;;  %1863 = vmatprep.subr.bf16.mxu1 %v2128_v53  ;;  %v2131_v2 = vmov -1e+30  }
  0x22   : > { %s1807_s27 = sshll.u32 %s569_s23, 3  ;;  %v2013_v14 = vld [vmem:[%s2640_s26 + $0x70] sm:$0xff]   ;;  %v2015_v16 = vld [vmem:[%s2640_s26 + $0x78] sm:$0xff]   ;;  %s2642_s23 = sld [smem:[#allocation14_spill]]  ;;  %vm774_vm5 = vcmp.lt.s32.totalorder %v773_v1, 5 }
  0x23   : > { %s572_s20 = scalar_lea.vmem %s2641_s19, %s1807_s27  ;;  %v2014_v15 = vld [vmem:[%s2640_s26 + $0x30] sm:$0xff]   ;;  %v2016_v17 = vld [vmem:[%s2640_s26 + $0x38] sm:$0xff]   ;;  %s2136_s27 = smov 16  }
  0x24   : > { %1811 = vmatpush3.bf16.msra.mxu0 %v2004_v3  ;;  %v574_v11 = vld [vmem:[%s572_s20] sm:$0xff]  ;;  %v2393_v3 = vsel %vm774_vm5, 0.0, %v2131_v2  ;;  %s2644_s19 = sld [smem:[#allocation15_spill]]  ;;  %s1804_s20 = sshll.u32 %s2255_s0, 4 }
  0x25   : > { %1812 = vmatprep.subr.bf16.mxu0 %v2005_v4  ;;  %v1748_v13 = vcombine.high %v574_v11, %v574_v11  ;;  %v1747_v18 = vcombine.low %v574_v11, %v574_v11  ;;  %s2138_s0 = smov [#allocation2]  }
  0x26   : > { %s2067_s2 = sshll.u32 %s2138_s0, 4  ;;  %s2068_s2 = int_to_ptr.vmem [resolvable:$false] %s2067_s2 }
  0x27   : > { %749 = vmatprep.mubr.bf16.mxu0 %v1748_v13  ;;  %s2069_s25 = scalar_lea.vmem %s2068_s2, 32 }
  0x28   : > { %1813 = vmatpush3.bf16.msra.mxu0 %v2006_v5  ;;  %v1746_v22 = vld [vmem:[%s2642_s23] ss:$0 sm:$0xff] }
  0x29   : > { %1814 = vmatprep.subr.bf16.mxu0 %v2007_v6 }
  0x2c   : > { %1815 = vmatpush3.bf16.msra.mxu0 %v2008_v7 }
  0x2d   : > { %1816 = vmatprep.subr.bf16.mxu0 %v2009_v8 }
  0x30   : > { %1817 = vmatpush3.bf16.msra.mxu0 %v2010_v9 }
  0x31   : > { %1818 = vmatprep.subr.bf16.mxu0 %v2011_v10 }
  0x34   : > { %1819 = vmatpush3.bf16.msra.mxu0 %v2012_v12 }
  0x35   : > { %1820 = vmatprep.subr.bf16.mxu0 %v2013_v14 }
  0x38   : > { %1821 = vmatpush3.bf16.msra.mxu0 %v2014_v15 }
  0x39   : > { %1822 = vmatprep.subr.bf16.mxu0 %v2015_v16 }
  0x3c   : > { %1823 = vmatpush3.bf16.msra.mxu0 %v2016_v17 }
  0x3d   : > { %1905 = vmatprep.subr.bf16.mxu0 %v2128_v53 }
  0x3f   : > { %750 = vmatmul.mubr.bf16.vlgmr.msra.gmra.mrb[0].mxu0 %v1747_v18 }
  0x40   : > { %1907 = vmatprep.mubr.msk.bf16.mxu0 %vm2129_vm2, %v2128_v53 }
 0x112   : > { %v1824_v21 = vpop.f32.mrb[0].mxu0 }
 0x113   : > { %v1825_v23 = vpop.f32.mrb[1].mxu0 }
 0x114   : > { %v1826_v24 = vadd.f32 %v1825_v23, %v1824_v21  ;;  %v1827_v25 = vpop.f32.mrb[2].mxu0 }
 0x115   : > { %v1828_v26 = vpop.f32.mrb[3].mxu0 }
 0x116   : > { %v752_v28 = vadd.f32 %v1826_v24, %v1746_v22 }
 0x118   : > { %v769_v30 = vsel %vm759_vm0, %v1765_v27, %v752_v28 }
 0x119   : > { %v2345_v31 = vadd.f32 %v770_v29, %v769_v30 }
 0x11b   : > { %v779_v32 = vsel %vm778_vm1, %v2345_v31, 0.0 }
 0x11c   : > { %780 = vadd.xlane.f32.xlu0 %v779_v32 }
 0x1a9   : > { %v781_v33 = vpop.xlane.xlu0 %780 }
 0x1aa   : > { %v783_v34 = vmul.f32 0.03125, %v781_v33 }
 0x1ac   : > { %v784_v35 = vsub.f32 %v2345_v31, %v783_v34 }
 0x1ae   : > { %v785_v36 = vmul.f32 %v784_v35, %v784_v35 }
 0x1b0   : > { %v786_v37 = vsel %vm778_vm1, %v785_v36, 0.0 }
 0x1b1   : > { %787 = vadd.xlane.f32.xlu0 %v786_v37 }
 0x23e   : > { %v788_v43 = vpop.xlane.xlu0 %787 }
 0x23f   : > { %v789_v44 = vmul.f32 0.03125, %v788_v43 }
 0x241   : > { %v790_v45 = vadd.f32 1e-05, %v789_v44 }
 0x243   : > { %2039 = vrsqrt.f32 %v790_v45 }
 0x24d   : > { %v2040_v46 = vpop.eup %2039 }
 0x24e   : > { %v792_v48 = vmul.f32 %v2040_v46, %v784_v35 }
 0x250   : > { %v799_v50 = vmul.f32 %v1766_v47, %v792_v48 }
 0x252   : > { %v806_v51 = vadd.f32 %v1767_v49, %v799_v50 }
 0x254   : > { %v807_v52 = vpack.c.bf16 %v806_v51, %v806_v51 }
 0x256   : > { %1772 = vmatmul.mubr.msk.bf16.vlgmr.msra.gmra.mrb[0].mxu1 %vm778_vm1, %v807_v52 }
 0x257   : > { %1865 = vmatprep.mubr.msk.bf16.mxu1 %vm2129_vm2, %v2128_v53 }
 0x329   : > { %v869_v54 = vpop.f32.mrb[0].mxu1 }
 0x32a   : > { %v2376_v55 = vpack.c.bf16 %v869_v54, %v869_v54  ;;  %v871_v56 = vpop.f32.mrb[1].mxu1  ;;  %v876_v61 = vmul.f32 0.25, %v869_v54 }
 0x32b   : > { %v873_v57 = vpop.f32.mrb[2].mxu1  ;;  %v2381_v62 = vpack.c.bf16 %v871_v56, %v871_v56 }
 0x32c   : > { %880 = vrot.lane.b32.xlu1 %v2376_v55, %s2130_s29  ;;  %v874_v58 = vpop.f32.mrb[3].mxu1  ;;  %v2383_v63 = vpack.c.bf16 %v876_v61, %v876_v61 }
 0x32d   : > { %v948_v0 = vsel %vm946_vm4, %v2381_v62, 0 }
 0x39e   : > { %v881_v59 = vpop.permute.xlu1 %880 }
 0x39f   : > { %v887_v60 = vsel %vm882_vm3, %v881_v59, 0 }
 0x3a0   : > { %1864 = vmatpush3.bf16.xpose.msra.mxu1 %v887_v60 }
 0x3a1   : > { %1869 = vmatprep.subr.bf16.mxu1 %v2128_v53 }
 0x3a7   : > { %1866 = vmatmul.mubr.msk.bf16.vlgmr.msra.gmra.mrb[4].mxu1 %vm882_vm3, %v2383_v63 }
 0x3a8   : > { %1870 = vmatpush3.bf16.msra.mxu1 %v948_v0  ;;  %1871 = vmatprep.mubr.msk.bf16.mxu1 %vm2129_vm2, %v2128_v53 }
 0x3a9   : > { %1875 = vmatprep.subr.bf16.mxu1 %v2128_v53 }
 0x47a   : > { %v923_v4 = vpop.f32.mrb[4].mxu1 }
 0x47b   : > { %v924_v5 = vadd.f32 %v923_v4, %v2393_v3  ;;  %v1867_v6 = vpop.f32.mrb[5].mxu1 }
 0x47c   : > { %v926_v7 = vpop.f32.mrb[6].mxu1 }
 0x47d   : > { %v1868_v8 = vpop.f32.mrb[7].mxu1  ;;  %v930_v9 = vsel %vm929_vm6, %v924_v5, -inf }
 0x47e   : > { %931 = vmax.xlane.f32.xlu1 %v930_v9 }
 0x48f   : > { %1054 = vrot.lane.b32.xlu1 %v2381_v62, %s2132_s1 }
 0x50b   : > { %v932_v10 = vpop.xlane.xlu1 %931 }
 0x50c   : > { %v933_v11 = vsub.f32 %v924_v5, %v932_v10 }
 0x50e   : > { %v934_v12 = vmul.f32 1.442695, %v933_v11 }
 0x50f   : > { %v1055_v21 = vpop.permute.xlu1 %1054 }
 0x510   : > { %2041 = vpow2.f32 %v934_v12  ;;  %v1060_v23 = vsel %vm946_vm4, %v1055_v21, 0 }
 0x51a   : > { %v2042_v13 = vpop.eup %2041 }
 0x51b   : > { %v936_v14 = vsel %vm929_vm6, %v2042_v13, 0.0 }
 0x51c   : > { %937 = vadd.xlane.f32.xlu0 %v936_v14 }
 0x532   : > { %993 = vrot.lane.b32.xlu0 %v2376_v55, %s2133_s24 }
 0x536   : > { %991 = vrot.lane.b32.xlu0 %v2383_v63, %s2132_s1  ;;  %s2645_s1 = sld [smem:[#allocation16_spill]] }
 0x5a9   : > { %v938_v15 = vpop.xlane.xlu0 %937 }
 0x5aa   : > { %2043 = vrcp.f32 %v938_v15 }
 0x5ad   : > { %v994_v18 = vpop.permute.xlu0 %993 }
 0x5ae   : > { %v999_v20 = vsel %vm882_vm3, %v994_v18, 0 }
 0x5b1   : > { %v992_v22 = vpop.permute.xlu0 %991 }
 0x5b4   : > { %v2044_v16 = vpop.eup %2043 }
 0x5b5   : > { %v940_v17 = vmul.f32 %v2044_v16, %v2042_v13 }
 0x5b7   : > { %v941_v19 = vpack.c.bf16 %v940_v17, %v940_v17 }
 0x5b9   : > { %1872 = vmatmul.mubr.msk.bf16.vlgmr.msra.gmra.mrb[8].mxu1 %vm929_vm6, %v941_v19 }
 0x5ba   : > { %1876 = vmatpush3.bf16.xpose.msra.mxu1 %v999_v20  ;;  %1877 = vmatprep.mubr.msk.bf16.mxu1 %vm2129_vm2, %v2128_v53 }
 0x5bb   : > { %1881 = vmatprep.subr.bf16.mxu1 %v2128_v53 }
 0x5c1   : > { %1878 = vmatmul.mubr.msk.bf16.vlgmr.msra.gmra.mrb[12].mxu1 %vm882_vm3, %v992_v22 }
 0x5c2   : > { %1882 = vmatpush3.bf16.msra.mxu1 %v1060_v23  ;;  %1883 = vmatprep.mubr.msk.bf16.mxu1 %vm2129_vm2, %v2128_v53 }
 0x5c3   : > { %1887 = vmatprep.subr.bf16.mxu1 %v2128_v53 }
 0x68c   : > { %v2412_v24 = vpop.f32.mrb[8].mxu1 }
 0x68d   : > { %v1873_v25 = vpop.f32.mrb[9].mxu1 }
 0x68e   : > { %v987_v26 = vpop.f32.mrb[10].mxu1 }
 0x68f   : > { %v1874_v27 = vpop.f32.mrb[11].mxu1 }
 0x694   : > { %v1035_v28 = vpop.f32.mrb[12].mxu1 }
 0x695   : > { %v1036_v29 = vadd.f32 %v1035_v28, %v2393_v3  ;;  %v1879_v30 = vpop.f32.mrb[13].mxu1 }
 0x696   : > { %v1038_v32 = vpop.f32.mrb[14].mxu1 }
 0x697   : > { %v1880_v33 = vpop.f32.mrb[15].mxu1  ;;  %v1041_v34 = vsel %vm929_vm6, %v1036_v29, -inf  ;;  %v2026_v32 = vld [vmem:[%s2605_s8 + $0x8] sm:$0xff]  }
 0x698   : > { %1042 = vmax.xlane.f32.xlu0 %v1041_v34  ;;  %v2027_v33 = vld [vmem:[%s2605_s8 + $0x10] sm:$0xff]   ;;  %v2028_v34 = vld [vmem:[%s2605_s8 + $0x18] sm:$0xff]  }
 0x725   : > { %v1043_v35 = vpop.xlane.xlu0 %1042 }
 0x726   : > { %v1044_v36 = vsub.f32 %v1036_v29, %v1043_v35 }
 0x728   : > { %v1045_v37 = vmul.f32 1.442695, %v1044_v36 }
 0x72a   : > { %2045 = vpow2.f32 %v1045_v37 }
 0x734   : > { %v2046_v38 = vpop.eup %2045 }
 0x735   : > { %v1047_v39 = vsel %vm929_vm6, %v2046_v38, 0.0 }
 0x736   : > { %1048 = vadd.xlane.f32.xlu1 %v1047_v39 }
 0x747   : > { %1104 = vrot.lane.b32.xlu1 %v2376_v55, %s2134_s17 }
 0x74b   : > { %1102 = vrot.lane.b32.xlu1 %v2383_v63, %s2135_s18 }
 0x7c3   : > { %v1049_v40 = vpop.xlane.xlu1 %1048 }
 0x7c4   : > { %2047 = vrcp.f32 %v1049_v40 }
 0x7c7   : > { %v1105_v43 = vpop.permute.xlu1 %1104 }
 0x7c8   : > { %v1110_v45 = vsel %vm882_vm3, %v1105_v43, 0 }
 0x7cb   : > { %v1103_v46 = vpop.permute.xlu1 %1102 }
 0x7ce   : > { %v2048_v41 = vpop.eup %2047 }
 0x7cf   : > { %v1051_v42 = vmul.f32 %v2048_v41, %v2046_v38 }
 0x7d1   : > { %v1052_v44 = vpack.c.bf16 %v1051_v42, %v1051_v42 }
 0x7d3   : > { %1884 = vmatmul.mubr.msk.bf16.vlgmr.msra.gmra.mrb[16].mxu1 %vm929_vm6, %v1052_v44 }
 0x7d4   : > { %1888 = vmatpush3.bf16.xpose.msra.mxu1 %v1110_v45  ;;  %1889 = vmatprep.mubr.msk.bf16.mxu1 %vm2129_vm2, %v2128_v53 }
 0x7d5   : > { %1893 = vmatprep.subr.bf16.mxu1 %v2128_v53 }
 0x7db   : > { %1890 = vmatmul.mubr.msk.bf16.vlgmr.msra.gmra.mrb[20].mxu1 %vm882_vm3, %v1103_v46  ;;  %v1781_v46 = vld [vmem:[%s2606_s9] ss:$0 sm:$0xff] }
 0x7dc   : > { %1895 = vmatprep.mubr.msk.bf16.mxu1 %vm2129_vm2, %v2128_v53 }
 0x8a6   : > { %v1096_v47 = vpop.f32.mrb[16].mxu1 }
 0x8a7   : > { %v1885_v48 = vpop.f32.mrb[17].mxu1 }
 0x8a8   : > { %v1099_v49 = vpop.f32.mrb[18].mxu1 }
 0x8a9   : > { %v1886_v50 = vpop.f32.mrb[19].mxu1 }
 0x8ae   : > { %v1146_v51 = vpop.f32.mrb[20].mxu1 }
 0x8af   : > { %v1147_v52 = vadd.f32 %v1146_v51, %v2393_v3  ;;  %v1891_v54 = vpop.f32.mrb[21].mxu1 }
 0x8b0   : > { %v1149_v56 = vpop.f32.mrb[22].mxu1 }
 0x8b1   : > { %v1892_v57 = vpop.f32.mrb[23].mxu1  ;;  %v1152_v58 = vsel %vm929_vm6, %v1147_v52, -inf }
 0x8b2   : > { %1153 = vmax.xlane.f32.xlu0 %v1152_v58 }
 0x8c8   : > { %1164 = vrot.lane.b32.xlu0 %v2381_v62, %s2135_s18 }
 0x8cc   : > { %1214 = vrot.lane.b32.xlu0 %v2376_v55, %s2136_s27 }
 0x8d0   : > { %1212 = vrot.lane.b32.xlu0 %v2383_v63, %s2137_s30 }
 0x93f   : > { %v1154_v59 = vpop.xlane.xlu0 %1153 }
 0x940   : > { %v1155_v60 = vsub.f32 %v1147_v52, %v1154_v59 }
 0x942   : > { %v1156_v61 = vmul.f32 1.442695, %v1155_v60  ;;  %v2029_v60 = vld [vmem:[%s2609_s12] sm:$0xff]  }
 0x943   : > { %v1165_v0 = vpop.permute.xlu0 %1164 }
 0x944   : > { %2049 = vpow2.f32 %v1156_v61  ;;  %v1170_v1 = vsel %vm946_vm4, %v1165_v0, 0 }
 0x945   : > { %1894 = vmatpush3.bf16.msra.mxu1 %v1170_v1 }
 0x946   : > { %1899 = vmatprep.subr.bf16.mxu1 %v2128_v53 }
 0x947   : > { %v1215_v7 = vpop.permute.xlu0 %1214 }
 0x948   : > { %v1220_v8 = vsel %vm882_vm3, %v1215_v7, 0 }
 0x94b   : > { %v1213_v9 = vpop.permute.xlu0 %1212 }
 0x94e   : > { %v2050_v2 = vpop.eup %2049 }
 0x94f   : > { %v1158_v4 = vsel %vm929_vm6, %v2050_v2, 0.0 }
 0x950   : > { %1159 = vadd.xlane.f32.xlu1 %v1158_v4  ;;  %v1787_v4 = vld [vmem:[%s2607_s10] ss:$0 sm:$0xff] }
 0x9dd   : > { %v1160_v5 = vpop.xlane.xlu1 %1159 }
 0x9de   : > { %2051 = vrcp.f32 %v1160_v5 }
 0x9e8   : > { %v2052_v55 = vpop.eup %2051 }
 0x9e9   : > { %v1162_v6 = vmul.f32 %v2052_v55, %v2050_v2  ;;  %v1788_v55 = vld [vmem:[%s2608_s11] ss:$0 sm:$0xff] }
 0x9eb   : > { %v1163_v63 = vpack.c.bf16 %v1162_v6, %v1162_v6 }
 0x9ed   : > { %1896 = vmatmul.mubr.msk.bf16.vlgmr.msra.gmra.mrb[24].mxu1 %vm929_vm6, %v1163_v63 }
 0x9ee   : > { %1900 = vmatpush3.bf16.xpose.msra.mxu1 %v1220_v8  ;;  %1901 = vmatprep.mubr.msk.bf16.mxu1 %vm2129_vm2, %v2128_v53  ;;  %v2031_v8 = vld [vmem:[%s2611_s14] sm:$0xff]  }
 0x9ef   : > { %1911 = vmatprep.subr.bf16.mxu1 %v2128_v53 }
 0x9f5   : > { %1902 = vmatmul.mubr.msk.bf16.vlgmr.msra.gmra.mrb[28].mxu1 %vm882_vm3, %v1213_v9  ;;  %v2032_v9 = vld [vmem:[%s2611_s14 + $0x8] sm:$0xff]  }
 0x9f6   : > { %1919 = vmatprep.mubr.msk.bf16.mxu1 %vm2129_vm2, %v2128_v53 }
 0xac0   : > { %v1206_v10 = vpop.f32.mrb[24].mxu1 }
 0xac1   : > { %v1897_v11 = vpop.f32.mrb[25].mxu1 }
 0xac2   : > { %v1209_v12 = vpop.f32.mrb[26].mxu1  ;;  %v2034_v11 = vld [vmem:[%s2611_s14 + $0x18] sm:$0xff]  }
 0xac3   : > { %v1898_v13 = vpop.f32.mrb[27].mxu1  ;;  %v2035_v12 = vld [vmem:[%s2611_s14 + $0x20] sm:$0xff]  }
 0xac4   : > { %v2036_v13 = vld [vmem:[%s2611_s14 + $0x28] sm:$0xff]  }
 0xac8   : > { %v1256_v14 = vpop.f32.mrb[28].mxu1 }
 0xac9   : > { %v1257_v15 = vadd.f32 %v1256_v14, %v2393_v3  ;;  %v1903_v16 = vpop.f32.mrb[29].mxu1  ;;  %v2037_v14 = vld [vmem:[%s2611_s14 + $0x30] sm:$0xff]  }
 0xaca   : > { %v1259_v17 = vpop.f32.mrb[30].mxu1  ;;  %v1789_v16 = vld [vmem:[%s2610_s13] ss:$0 sm:$0xff] }
 0xacb   : > { %v1904_v18 = vpop.f32.mrb[31].mxu1  ;;  %v1262_v19 = vsel %vm929_vm6, %v1257_v15, -inf }
 0xacc   : > { %1263 = vmax.xlane.f32.xlu0 %v1262_v19 }
 0xb59   : > { %v1264_v20 = vpop.xlane.xlu0 %1263 }
 0xb5a   : > { %v1265_v21 = vsub.f32 %v1257_v15, %v1264_v20  ;;  %v2038_v15 = vld [vmem:[%s2611_s14 + $0x38] sm:$0xff]  }
 0xb5c   : > { %v1266_v22 = vmul.f32 1.442695, %v1265_v21 }
 0xb5e   : > { %2053 = vpow2.f32 %v1266_v22 }
 0xb68   : > { %v2054_v23 = vpop.eup %2053 }
 0xb69   : > { %v1268_v25 = vsel %vm929_vm6, %v2054_v23, 0.0 }
 0xb6a   : > { %1269 = vadd.xlane.f32.xlu1 %v1268_v25 }
 0xb7b   : > { %1274 = vrot.lane.b32.xlu1 %v2381_v62, %s2137_s30  ;;  %v2025_v62 = vld [vmem:[%s2605_s8] sm:$0xff]  }
 0xb7c   : > { %1912 = vmatpush3.bf16.msra.mxu1 %v2025_v62  ;;  %v1793_v62 = vld [vmem:[%s2612_s15] ss:$0 sm:$0xff] }
 0xb7d   : > { %1913 = vmatprep.subr.bf16.mxu1 %v2128_v53 }
 0xb7f   : > { %1323 = vrot.lane.b32.xlu1 %v1096_v47, %s2136_s27 }
 0xb80   : > { %1914 = vmatpush3.bf16.msra.mxu1 %v2026_v32 }
 0xb81   : > { %1915 = vmatprep.subr.bf16.mxu1 %v2128_v53 }
 0xb83   : > { %1327 = vrot.lane.b32.xlu1 %v1206_v10, %s2134_s17  ;;  %v2033_v10 = vld [vmem:[%s2611_s14 + $0x10] sm:$0xff]   ;;  %s2555_s17 = scalar_lea.hbm %s2645_s1, %s1804_s20 }
 0xb84   : > { %1916 = vmatpush3.bf16.msra.mxu1 %v2027_v33 }
 0xb85   : > { %1917 = vmatprep.subr.bf16.mxu1 %v2128_v53 }
 0xb88   : > { %1918 = vmatpush3.bf16.msra.mxu1 %v2028_v34 }
 0xbf7   : > { %v1270_v3 = vpop.xlane.xlu1 %1269 }
 0xbf8   : > { %2055 = vrcp.f32 %v1270_v3 }
 0xbfb   : > { %v1275_v26 = vpop.permute.xlu1 %1274 }
 0xbfc   : > { %v1280_v27 = vsel %vm946_vm4, %v1275_v26, 0 }
 0xbfd   : > { %1906 = vmatpush3.bf16.msra.mxu0 %v1280_v27 }
 0xbfe   : > { %1923 = vmatprep.subr.bf16.mxu0 %v2128_v53 }
 0xbff   : > { %v1324_v39 = vpop.permute.xlu1 %1323 }
 0xc00   : > { %v1334_v41 = vsel %vm882_vm3, %v2412_v24, %v1324_v39 }
 0xc02   : > { %v2056_v28 = vpop.eup %2055 }
 0xc03   : > { %v1272_v29 = vmul.f32 %v2056_v28, %v2054_v23  ;;  %v1328_v40 = vpop.permute.xlu1 %1327 }
 0xc04   : > { %v1335_v42 = vsel %vm778_vm1, %v1334_v41, %v1328_v40 }
 0xc05   : > { %v1273_v30 = vpack.c.bf16 %v1272_v29, %v1272_v29 }
 0xc07   : > { %1908 = vmatmul.mubr.msk.bf16.vlgmr.msra.gmra.mrb[4].mxu0 %vm929_vm6, %v1273_v30 }
 0xc08   : > { %1927 = vmatprep.mubr.msk.bf16.mxu0 %vm2129_vm2, %v2128_v53  ;;  %1924 = vmatpush3.bf16.msra.mxu0 %v2029_v60 }
 0xc09   : > { %1925 = vmatprep.subr.bf16.mxu0 %v2128_v53 }
 0xcda   : > { %v1316_v35 = vpop.f32.mrb[4].mxu0 }
 0xcdb   : > { %1331 = vrot.lane.b32.xlu0 %v1316_v35, %s2133_s24  ;;  %v1909_v36 = vpop.f32.mrb[5].mxu0  ;;  %s566_s24 = sand.u32 1, %s2117_s28  }
 0xcdc   : > { %v1319_v37 = vpop.f32.mrb[6].mxu0  ;;  %s567_s23 = scalar_lea.vmem [#allocation2], %s566_s24  ;;  %s1673_s18 = scalar_lea.sflag [#allocation3], %s566_s24 }
 0xcdd   : > { %v1910_v38 = vpop.f32.mrb[7].mxu0  ;;  %s1685_s22 = sshll.u32 %s567_s23, 4  ;;  %s2557_s22 = int_to_ptr.vmem [resolvable:$true] %s1685_s22 }
 0xcde   : > { %s2063_s27 = scalar_lea.vmem %s2557_s22, 16  ;;  %p2070_p0 = scmp.lt.s32.totalorder %s2557_s22, %s2068_s2 }
 0xcdf   : > { %p2064_p11 = scmp.ne.s32.totalorder %s2557_s22, %s2063_s27  ;;  %p2071_p1 = scmp.lt.s32.totalorder %s2069_s25, %s2063_s27 }
 0xce1   : > { %p2065_p12 = pnand %p2064_p11, %p2272_p5  ;;  %p2072_p2 = por %p2071_p1, %p2070_p0 }
 0xce3   : > { %p2066_p13 = pneg %p2065_p12 }
 0xce5   : > { %p2073_p3 = pnand %p2072_p2, %p2066_p13 }
 0xd4d   : > { %v1332_v43 = vpop.permute.xlu0 %1331 }
 0xd4e   : > { %v1337_v44 = vsel %vm1336_vm7, %v1335_v42, %v1332_v43 }
 0xd4f   : > { %v1338_v45 = vpack.c.bf16 %v1337_v44, %v1337_v44 }
 0xd51   : > { %1920 = vmatmul.mubr.msk.bf16.vlgmr.msra.gmra.mrb[32].mxu1 %vm1378_vm8, %v1338_v45 }
 0xe24   : > { %v1416_v47 = vpop.f32.mrb[32].mxu1 }
 0xe25   : > { %v1417_v48 = vadd.f32 %v1781_v46, %v1416_v47  ;;  %v1921_v49 = vpop.f32.mrb[33].mxu1 }
 0xe26   : > { %v1419_v50 = vpop.f32.mrb[34].mxu1 }
 0xe27   : > { %v2481_v51 = vadd.f32 %v1417_v48, %v2345_v31  ;;  %v1922_v52 = vpop.f32.mrb[35].mxu1  ;;  %v2030_v31 = vld [vmem:[%s2609_s12 + $0x8] sm:$0xff]   ;;  %v1802_v48 = vld [vmem:[%s2613_s16] ss:$0 sm:$0xff] }
 0xe28   : > { %1926 = vmatpush3.bf16.msra.mxu0 %v2030_v31  ;;  %v1803_v50 = vld [vmem:[%s2644_s19] ss:$0 sm:$0xff] }
 0xe29   : > { %v1425_v24 = vsel %vm778_vm1, %v2481_v51, 0.0  ;;  %1931 = vmatprep.subr.bf16.mxu0 %v2128_v53 }
 0xe2a   : > { %1426 = vadd.xlane.f32.xlu1 %v1425_v24 }
 0xeb7   : > { %v1427_v54 = vpop.xlane.xlu1 %1426 }
 0xeb8   : > { %v1428_v56 = vmul.f32 0.03125, %v1427_v54 }
 0xeba   : > { %v1429_v57 = vsub.f32 %v2481_v51, %v1428_v56 }
 0xebc   : > { %v1430_v58 = vmul.f32 %v1429_v57, %v1429_v57 }
 0xebe   : > { %v1431_v59 = vsel %vm778_vm1, %v1430_v58, 0.0 }
 0xebf   : > { %1432 = vadd.xlane.f32.xlu0 %v1431_v59 }
 0xf4c   : > { %v1433_v61 = vpop.xlane.xlu0 %1432 }
 0xf4d   : > { %v1434_v0 = vmul.f32 0.03125, %v1433_v61 }
 0xf4f   : > { %v1435_v1 = vadd.f32 1e-05, %v1434_v0 }
 0xf51   : > { %2057 = vrsqrt.f32 %v1435_v1 }
 0xf5b   : > { %v2058_v2 = vpop.eup %2057 }
 0xf5c   : > { %v1437_v5 = vmul.f32 %v2058_v2, %v1429_v57 }
 0xf5e   : > { %v1444_v6 = vmul.f32 %v1787_v4, %v1437_v5 }
 0xf60   : > { %v1451_v7 = vadd.f32 %v1788_v55, %v1444_v6 }
 0xf62   : > { %v1452_v63 = vpack.c.bf16 %v1451_v7, %v1451_v7 }
 0xf64   : > { %1928 = vmatmul.mubr.msk.bf16.vlgmr.msra.gmra.mrb[8].mxu0 %vm778_vm1, %v1452_v63 }
 0xf65   : > { %1947 = vmatprep.mubr.msk.bf16.mxu0 %vm2129_vm2, %v2128_v53  ;;  %1932 = vmatpush3.bf16.msra.mxu0 %v2031_v8 }
 0xf66   : > { %1933 = vmatprep.subr.bf16.mxu0 %v2128_v53 }
 0xf69   : > { %1934 = vmatpush3.bf16.msra.mxu0 %v2032_v9 }
 0xf6a   : > { %1935 = vmatprep.subr.bf16.mxu0 %v2128_v53 }
 0xf6d   : > { %1936 = vmatpush3.bf16.msra.mxu0 %v2033_v10 }
 0xf6e   : > { %1937 = vmatprep.subr.bf16.mxu0 %v2128_v53 }
 0xf71   : > { %1938 = vmatpush3.bf16.msra.mxu0 %v2034_v11 }
 0xf72   : > { %1939 = vmatprep.subr.bf16.mxu0 %v2128_v53 }
 0xf75   : > { %1940 = vmatpush3.bf16.msra.mxu0 %v2035_v12 }
 0xf76   : > { %1941 = vmatprep.subr.bf16.mxu0 %v2128_v53 }
 0xf79   : > { %1942 = vmatpush3.bf16.msra.mxu0 %v2036_v13 }
 0xf7a   : > { %1943 = vmatprep.subr.bf16.mxu0 %v2128_v53 }
 0xf7d   : > { %1944 = vmatpush3.bf16.msra.mxu0 %v2037_v14 }
 0xf7e   : > { %1945 = vmatprep.subr.bf16.mxu0 %v2128_v53 }
 0xf81   : > { %1946 = vmatpush3.bf16.msra.mxu0 %v2038_v15 }
0x1037   : > { %v1513_v17 = vpop.f32.mrb[8].mxu0 }
0x1038   : > { %v1514_v18 = vadd.f32 %v1789_v16, %v1513_v17  ;;  %v1929_v19 = vpop.f32.mrb[9].mxu0 }
0x1039   : > { %v1516_v20 = vpop.f32.mrb[10].mxu0 }
0x103a   : > { %v1519_v21 = vmul.f32 %v1514_v18, %v1514_v18  ;;  %v1930_v22 = vpop.f32.mrb[11].mxu0 }
0x103c   : > { %v1520_v23 = vmul.f32 %v1519_v21, %v1514_v18 }
0x103e   : > { %v1521_v25 = vmul.f32 0.044715, %v1520_v23 }
0x1040   : > { %v1522_v3 = vadd.f32 %v1521_v25, %v1514_v18 }
0x1042   : > { %v1523_v26 = vmul.f32 0.7978846, %v1522_v3 }
0x1044   : > { %2059 = vtanh.f32 %v1523_v26 }
0x104e   : > { %v2060_v27 = vpop.eup %2059 }
0x104f   : > { %v1525_v28 = vadd.f32 1.0, %v2060_v27 }
0x1051   : > { %v1526_v29 = vmul.f32 0.5, %v1525_v28 }
0x1053   : > { %v1527_v53 = vmul.f32 %v1526_v29, %v1514_v18 }
0x1055   : > { %v1528_v30 = vpack.c.bf16 %v1527_v53, %v1527_v53 }
0x1057   : > { %1948 = vmatmul.mubr.bf16.vlgmr.msra.gmra.mrb[12].mxu0 %v1528_v30 }
0x112a   : > { %v1634_v32 = vpop.f32.mrb[12].mxu0 }
0x112b   : > { %v1635_v33 = vadd.f32 %v1793_v62, %v1634_v32  ;;  %v1949_v34 = vpop.f32.mrb[13].mxu0 }
0x112c   : > { %v1637_v35 = vpop.f32.mrb[14].mxu0 }
0x112d   : > { %v1950_v36 = vpop.f32.mrb[15].mxu0  ;;  %v1640_v37 = vadd.f32 %v1635_v33, %v2481_v51 }
0x112f   : > { %v1643_v38 = vsel %vm778_vm1, %v1640_v37, 0.0 }
0x1130   : > { %1644 = vadd.xlane.f32.xlu1 %v1643_v38 }
0x11bd   : > { %v1645_v39 = vpop.xlane.xlu1 %1644 }
0x11be   : > { %v1646_v40 = vmul.f32 0.03125, %v1645_v39 }
0x11c0   : > { %v1647_v41 = vsub.f32 %v1640_v37, %v1646_v40 }
0x11c2   : > { %v1648_v42 = vmul.f32 %v1647_v41, %v1647_v41 }
0x11c4   : > { %v1649_v43 = vsel %vm778_vm1, %v1648_v42, 0.0 }
0x11c5   : > { %1650 = vadd.xlane.f32.xlu1 %v1649_v43 }
0x1252   : > { %v1651_v44 = vpop.xlane.xlu1 %1650 }
0x1253   : > { %v1652_v45 = vmul.f32 0.03125, %v1651_v44 }
0x1255   : > { %v1653_v46 = vadd.f32 1e-05, %v1652_v45 }
0x1257   : > { %2061 = vrsqrt.f32 %v1653_v46 }
0x1261   : > { %v2062_v47 = vpop.eup %2061 }
0x1262   : > { %v1655_v49 = vmul.f32 %v2062_v47, %v1647_v41 }
0x1264   : > { %v1662_v51 = vmul.f32 %v1802_v48, %v1655_v49 }
0x1266   : > { %v1669_v52 = vadd.f32 %v1803_v50, %v1662_v51 }
0x1268   : > { %1671 = vst.msk [vmem:[%s567_s23] sm:$0x1] %vm1670_vm9, %v1669_v52 }
0x1269   : > { %2076 = shalt.err (!%p2073_p3)
}
0x126a   : > { %s2077_s24 = scalar_lea.hbm %s2555_s17, 16  ;;  %s2081_s23 = scalar_lea.hbm %s2645_s1, 32 }
0x126b   : > { %p2078_p4 = scmp.ne.s32.totalorder %s2555_s17, %s2077_s24  ;;  %p2082_p9 = scmp.lt.u32.totalorder %s2555_s17, %s2645_s1 }
0x126c   : > { %p2083_p10 = scmp.lt.u32.totalorder %s2081_s23, %s2077_s24  ;;  %p2085_p12 = scmp.lt.u32.totalorder %s2077_s24, %s2555_s17 }
0x126d   : > { %p2079_p7 = pnand %p2078_p4, %p2272_p5 }
0x126e   : > { %p2084_p11 = por %p2083_p10, %p2082_p9 }
0x126f   : > { %p2080_p8 = pneg %p2079_p7 }
0x1270   : > { %p2086_p13 = por %p2085_p12, %p2084_p11 }
0x1272   : > { %p2087_p0 = pnand %p2086_p13, %p2080_p8 }
0x1274   : > { %2090 = shalt.err (!%p2087_p0)
}
0x1275   : > { %1951 = dma.vmem_to_hbm [thread:$0]  (%p2272_p5), %s2557_s22, 16, %s2555_s17, %s1673_s18  }
0x1276 PF: > { %s2646_s27 = sld [smem:[#allocation7_spill]]  ;;  %s2647_s0 = sld [smem:[#allocation5_spill]] }
0x127c   : > { %p1957_p1 = scmp.ge.s32.totalorder %s2646_s27, 2  ;;  %s1697_s25 = sand.u32 1, %s2647_s0  }
0x127d   : > { %s1698_s19 = scalar_lea.sflag [#allocation3], %s1697_s25 }
0x127e   : > { %p1954_p2 = pnand %p1957_p1, %p2276_p6 }
0x1280   : > { %2108 = dma.done.wait (!%p1954_p2), %s1698_s19, 16  }
0x1281   : > { %2110 = vsyncadd (!%p1954_p2), %s1698_s19, 4294967280  ;;  %s2649_s30 = sld [smem:[#allocation8_spill]]  ;;  %s2650_s24 = sld [smem:[#allocation6_spill]] }
0x1282   : > { %s2651_s29 = sld [smem:[#allocation9_spill]]  ;;  %s2652_s27 = smov %s2117_s28 }
0x1287   : > { %p28_p3 = scmp.ge.s32.totalorder %s2649_s30, 4   ;;  %s2653_s28 = smov %s2650_s24 }
0x1289   :  { %30 = sbr.rel (!%p28_p3) target bundleno = 9 (0x9), region = 127 }
0x1290   :  { %1702 = vsyncpa [#allocation3], 1 }
0x1291   :  { %1704 = vsyncpa [#allocation3 + $0x1], 1 }

</bundles_post_ra>
